<compile_context>
chip_gen: v7x
topology: tpu7x:2x2x1
jax: 0.10.0
libtpu: 0.0.40
codegen_flags: <defaults>
</compile_context>

<pallas_src>
import functools
import math

import jax
import jax.numpy as jnp
from jax import lax
from jax.experimental import pallas as pl
from jax.experimental.pallas import tpu as pltpu


# ---------------------------------------------------------------------------
# Fused kernel: proj1 + multi-head attention (query-tiled) + proj2
# ---------------------------------------------------------------------------

def _fused_attn_kernel(xq_ref, xf_ref, w1t_ref, b1_ref, w2t_ref, b2_ref, o_ref,
                       *, num_heads, head_dim):
    """One (batch, query-tile) pair per grid step.

    Feature-major layout (channels on sublanes, sequence on lanes):
      xq_ref  : (1, C, Tq)   query-tile input columns
      xf_ref  : (1, C, L)    full-sequence input (for K/V projection)
      w1t_ref : (3C, C) bf16 permuted+transposed proj1 weight (scale folded
                             into the first C rows)
      b1_ref  : (3C, 1) f32  permuted proj1 bias (scale folded into q part)
      w2t_ref : (C, C)  bf16 permuted+transposed proj2 weight
      b2_ref  : (C, 1)  f32  proj2 bias
      o_ref   : (1, C, Tq)   output tile (lane-dense, Tq multiple of 128)
    """
    C = num_heads * head_dim

    xq = xq_ref[0].astype(jnp.bfloat16)                       # (C, Tq)
    xf = xf_ref[0].astype(jnp.bfloat16)                       # (C, L)

    # proj1: q only needs the query-tile columns; k/v need the full sequence.
    q_all = jnp.dot(w1t_ref[0:C, :], xq,
                    preferred_element_type=jnp.float32) + b1_ref[0:C, :]      # (C, Tq)
    kv_all = jnp.dot(w1t_ref[C:3 * C, :], xf,
                     preferred_element_type=jnp.float32) + b1_ref[C:3 * C, :]  # (2C, L)

    # TODO(synk): for long sequences, replace the per-head full-key softmax
    # below with a flash-style online softmax over a KV grid axis (needed to
    # keep score tiles inside v7x's 64 MiB VMEM at large L).
    head_outs = []
    for h in range(num_heads):
        lo = h * head_dim
        hi = lo + head_dim
        q_h = q_all[lo:hi, :].astype(jnp.bfloat16)            # (Dh, Tq)
        k_h = kv_all[lo:hi, :].astype(jnp.bfloat16)           # (Dh, L)
        v_h = kv_all[C + lo:C + hi, :].astype(jnp.bfloat16)   # (Dh, L)

        # Scores in (keys, queries) orientation: s[m, l] = k[:, m] . q[:, l]
        # (scale already folded into q). No transpose around either matmul.
        s = lax.dot_general(k_h, q_h, (((0,), (0,)), ((), ())),
                            preferred_element_type=jnp.float32)  # (L, Tq) f32
        m = jnp.max(s, axis=0, keepdims=True)                    # (1, Tq)
        p = jnp.exp(s - m)                                       # f32 exp (EUP)
        denom = jnp.sum(p, axis=0, keepdims=True)                # (1, Tq)

        # o_h[d, l] = sum_m v[d, m] * p[m, l]  (unnormalized p, bf16 on MXU)
        o_h = lax.dot_general(v_h, p.astype(jnp.bfloat16),
                              (((1,), (0,)), ((), ())),
                              preferred_element_type=jnp.float32)  # (Dh, Tq)
        # Normalize after the PV matmul: (Dh, Tq) multiply instead of (L, Tq).
        o_h = o_h * pl.reciprocal(denom, approx=True)
        head_outs.append(o_h)

    # Merge heads in registers (8-row f32 pieces -> vreg-aligned concat).
    merged = jnp.concatenate(head_outs, axis=0).astype(jnp.bfloat16)  # (C, Tq)

    # proj2: lane-dense (C, Tq) output tile.
    y = jnp.dot(w2t_ref[...], merged,
                preferred_element_type=jnp.float32) + b2_ref[...]     # (C, Tq)
    o_ref[0] = y.astype(o_ref.dtype)


# ---------------------------------------------------------------------------
# Wrapper: weight re-layout (folds the einops rearranges + scale) + pallas_call
# ---------------------------------------------------------------------------

def attention_forward(x, w1, b1, w2, b2, num_heads):
    """x: (B, C, H, W) NCHW, like the PyTorch module. Returns (B, C, H, W).

    w1: (C, 3C)  (in, out) for proj1        b1: (3C,)
    w2: (C, C)   (in, out) for proj2        b2: (C,)
    """
    B, C, H, W = x.shape
    L = H * W
    assert C % num_heads == 0
    Dh = C // num_heads
    assert Dh % 8 == 0, "head_dim must be a multiple of 8 (f32 sublane tile)"
    scale = 1.0 / math.sqrt(Dh)

    # --- one-time weight re-layout (tiny tensors; done once in XLA) --------
    # proj1 columns: c*(num_heads*3) + h*3 + k  ->  k*C + h*Dh + c
    # (reproduces 'b L (C H K) -> K b H L C' with contiguous per-head slices)
    w1p = w1.reshape(C, Dh, num_heads, 3).transpose(0, 3, 2, 1).reshape(C, 3 * C)
    b1p = b1.reshape(Dh, num_heads, 3).transpose(2, 1, 0).reshape(3 * C)
    # proj2 rows: c*num_heads + h  ->  h*Dh + c
    # (reproduces 'b H (h w) C -> b h w (C H)' with contiguous per-head slices)
    w2p = w2.reshape(Dh, num_heads, C).transpose(1, 0, 2).reshape(C, C)

    # Feature-major (transposed) forms; fold 1/sqrt(Dh) into the q block.
    w1t = w1p.T                                   # (3C, C)
    w1t = w1t.at[:C, :].multiply(scale)
    b1p = b1p.at[:C].multiply(scale)
    w2t = w2p.T                                   # (C, C)

    w1t_bf = w1t.astype(jnp.bfloat16)
    w2t_bf = w2t.astype(jnp.bfloat16)
    b1c = b1p.reshape(3 * C, 1).astype(jnp.float32)
    b2c = b2.reshape(C, 1).astype(jnp.float32)

    # NCHW -> (B, C, L) is a free reshape (no data movement).
    x_cl = x.reshape(B, C, L)

    # Query tile: 128 lanes (lane-dense output) when possible.
    Tq = 128 if (L % 128 == 0) else L
    n_qt = L // Tq

    # TODO(synk): attention dropout (dropout_prob > 0) not implemented
    # (eval-mode forward, dropout_p = 0).
    kernel = functools.partial(_fused_attn_kernel, num_heads=num_heads,
                               head_dim=Dh)

    y_cl = pl.pallas_call(
        kernel,
        out_shape=jax.ShapeDtypeStruct((B, C, L), x.dtype),
        grid=(B, n_qt),
        in_specs=[
            pl.BlockSpec((1, C, Tq), lambda b, t: (b, 0, t)),   # x query tile
            pl.BlockSpec((1, C, L), lambda b, t: (b, 0, 0)),    # x full (K/V)
            pl.BlockSpec((3 * C, C), lambda b, t: (0, 0)),      # w1t (resident)
            pl.BlockSpec((3 * C, 1), lambda b, t: (0, 0)),      # b1
            pl.BlockSpec((C, C), lambda b, t: (0, 0)),          # w2t
            pl.BlockSpec((C, 1), lambda b, t: (0, 0)),          # b2
        ],
        out_specs=pl.BlockSpec((1, C, Tq), lambda b, t: (b, 0, t)),
        compiler_params=pltpu.CompilerParams(
            dimension_semantics=("parallel", "parallel"),
            vmem_limit_bytes=32 * 1024 * 1024),
    )(x_cl, x_cl, w1t_bf, b1c, w2t_bf, b2c)

    # (B, C, L) -> (B, C, H, W) is a free reshape.
    return y_cl.reshape(B, C, H, W)


# ---------------------------------------------------------------------------
# Pure-JAX reference (matches the PyTorch module semantics exactly, f32)
# ---------------------------------------------------------------------------

def attention_reference(x, w1, b1, w2, b2, num_heads):
    B, C, H, W = x.shape
    L = H * W
    Dh = C // num_heads
    xl = jnp.transpose(x, (0, 2, 3, 1)).reshape(B, L, C)
    qkv = xl @ w1 + b1
    qkv = qkv.reshape(B, L, Dh, num_heads, 3)
    qkv = jnp.transpose(qkv, (4, 0, 3, 1, 2))          # 'b L (C H K) -> K b H L C'
    q, k, v = qkv[0], qkv[1], qkv[2]
    s = jnp.einsum("bhld,bhmd->bhlm", q, k) / math.sqrt(Dh)
    p = jax.nn.softmax(s, axis=-1)
    o = jnp.einsum("bhlm,bhmd->bhld", p, v)
    o = o.reshape(B, num_heads, H, W, Dh)
    o = jnp.transpose(o, (0, 2, 3, 4, 1)).reshape(B, H, W, C)   # 'b H (h w) C -> b h w (C H)'
    y = o @ w2 + b2
    return jnp.transpose(y, (0, 3, 1, 2))              # 'b h w C -> b C h w'


# ---------------------------------------------------------------------------
# Demo
# ---------------------------------------------------------------------------

if __name__ == "__main__":
    B, C, H, W = 2, 32, 16, 16          # L = 256 (two 128-query tiles), Dh = 8
    num_heads = 4

    key = jax.random.PRNGKey(0)
    k1, k2, k3, k4, kx = jax.random.split(key, 5)
    # PyTorch Linear stores W as (out, in) and computes x @ W.T + b; here we
    # store W directly as (in, out), which is equivalent for a synthetic init.
    w1 = jax.random.normal(k1, (C, 3 * C), jnp.float32) * 0.02
    b1 = jax.random.normal(k2, (3 * C,), jnp.float32) * 0.02
    w2 = jax.random.normal(k3, (C, C), jnp.float32) * 0.02
    b2 = jax.random.normal(k4, (C,), jnp.float32) * 0.02

    x = jax.random.normal(kx, (B, C, H, W), jnp.float32)

    out = attention_forward(x, w1, b1, w2, b2, num_heads)
    out = jax.block_until_ready(out)

    ref = attention_reference(x, w1, b1, w2, b2, num_heads)
    assert out.shape == (B, C, H, W), out.shape
    # Tolerance accounts for bf16 MXU operands (softmax math stays in f32)
    # and the approximate (EUP) reciprocal in the softmax normalization;
    # observed error is far below this bound.
    max_err = float(jnp.max(jnp.abs(out - ref)))
    assert jnp.allclose(out, ref, atol=3e-3, rtol=3e-3), max_err

    print("KERNEL_OK")
</pallas_src>

<mosaic_0001>
module attributes {stable_mosaic.version = 11 : i64} {
  func.func @_fused_attn_kernel(%arg0: i32, %arg1: i32, %arg2: memref<1x32x128xf32, #tpu.memory_space<vmem>>, %arg3: memref<1x32x256xf32, #tpu.memory_space<vmem>>, %arg4: memref<96x32xbf16, #tpu.memory_space<vmem>>, %arg5: memref<96x1xf32, #tpu.memory_space<vmem>>, %arg6: memref<32x32xbf16, #tpu.memory_space<vmem>>, %arg7: memref<32x1xf32, #tpu.memory_space<vmem>>, %arg8: memref<1x32x128xf32, #tpu.memory_space<vmem>>) attributes {dimension_semantics = [#tpu.dimension_semantics<parallel>, #tpu.dimension_semantics<parallel>], iteration_bounds = array<i64: 2, 2>, scalar_prefetch = 0 : i64, scratch_operands = 0 : i64, tpu.core_type = #tpu.core_type<tc>, window_params = [{transform_indices = @transform_0, window_bounds = array<i64: 1, 32, 128>}, {transform_indices = @transform_1, window_bounds = array<i64: 1, 32, 256>}, {pipeline_mode = #tpu.pipeline_mode<synchronous>, transform_indices = @transform_2, window_bounds = array<i64: 96, 32>}, {pipeline_mode = #tpu.pipeline_mode<synchronous>, transform_indices = @transform_3, window_bounds = array<i64: 96, 1>}, {pipeline_mode = #tpu.pipeline_mode<synchronous>, transform_indices = @transform_4, window_bounds = array<i64: 32, 32>}, {pipeline_mode = #tpu.pipeline_mode<synchronous>, transform_indices = @transform_5, window_bounds = array<i64: 32, 1>}, {transform_indices = @transform_6, window_bounds = array<i64: 1, 32, 128>}]} {
    %c0 = arith.constant 0 : index
    %c0_0 = arith.constant 0 : index
    %c0_1 = arith.constant 0 : index
    %0 = vector.load %arg2[%c0, %c0_0, %c0_1] : memref<1x32x128xf32, #tpu.memory_space<vmem>>, vector<1x32x128xf32>
    %1 = vector.shape_cast %0 : vector<1x32x128xf32> to vector<32x128xf32>
    %2 = arith.truncf %1 : vector<32x128xf32> to vector<32x128xbf16>
    %c0_2 = arith.constant 0 : index
    %c0_3 = arith.constant 0 : index
    %c0_4 = arith.constant 0 : index
    %3 = vector.load %arg3[%c0_2, %c0_3, %c0_4] : memref<1x32x256xf32, #tpu.memory_space<vmem>>, vector<1x32x256xf32>
    %4 = vector.shape_cast %3 : vector<1x32x256xf32> to vector<32x256xf32>
    %5 = arith.truncf %4 : vector<32x256xf32> to vector<32x256xbf16>
    %c0_5 = arith.constant 0 : index
    %c0_6 = arith.constant 0 : index
    %6 = vector.load %arg4[%c0_5, %c0_6] : memref<96x32xbf16, #tpu.memory_space<vmem>>, vector<32x32xbf16>
    %cst = arith.constant dense<0.000000e+00> : vector<32x128xf32>
    %7 = tpu.matmul %6, %2, %cst {dimension_numbers = #tpu.dot_dimension_numbers<[1], [0], [0], [1], [0, 0, 1, 1], [], []>} : vector<32x32xbf16>, vector<32x128xbf16>, vector<32x128xf32> -> vector<32x128xf32>
    %c0_7 = arith.constant 0 : index
    %c0_8 = arith.constant 0 : index
    %8 = vector.load %arg5[%c0_7, %c0_8] : memref<96x1xf32, #tpu.memory_space<vmem>>, vector<32x1xf32>
    %9 = vector.broadcast %8 : vector<32x1xf32> to vector<32x128xf32>
    %10 = arith.addf %7, %9 : vector<32x128xf32>
    %c32 = arith.constant 32 : index
    %c0_9 = arith.constant 0 : index
    %11 = vector.load %arg4[%c32, %c0_9] : memref<96x32xbf16, #tpu.memory_space<vmem>>, vector<64x32xbf16>
    %cst_10 = arith.constant dense<0.000000e+00> : vector<64x256xf32>
    %12 = tpu.matmul %11, %5, %cst_10 {dimension_numbers = #tpu.dot_dimension_numbers<[1], [0], [0], [1], [0, 0, 1, 1], [], []>} : vector<64x32xbf16>, vector<32x256xbf16>, vector<64x256xf32> -> vector<64x256xf32>
    %c32_11 = arith.constant 32 : index
    %c0_12 = arith.constant 0 : index
    %13 = vector.load %arg5[%c32_11, %c0_12] : memref<96x1xf32, #tpu.memory_space<vmem>>, vector<64x1xf32>
    %14 = vector.broadcast %13 : vector<64x1xf32> to vector<64x256xf32>
    %15 = arith.addf %12, %14 : vector<64x256xf32>
    %16 = vector.extract_strided_slice %10 {offsets = [0, 0], sizes = [8, 128], strides = [1, 1]} : vector<32x128xf32> to vector<8x128xf32>
    %17 = arith.truncf %16 : vector<8x128xf32> to vector<8x128xbf16>
    %18 = vector.extract_strided_slice %15 {offsets = [0, 0], sizes = [8, 256], strides = [1, 1]} : vector<64x256xf32> to vector<8x256xf32>
    %19 = arith.truncf %18 : vector<8x256xf32> to vector<8x256xbf16>
    %20 = vector.extract_strided_slice %15 {offsets = [32, 0], sizes = [8, 256], strides = [1, 1]} : vector<64x256xf32> to vector<8x256xf32>
    %21 = arith.truncf %20 : vector<8x256xf32> to vector<8x256xbf16>
    %cst_13 = arith.constant dense<0.000000e+00> : vector<256x128xf32>
    %22 = tpu.matmul %19, %17, %cst_13 {dimension_numbers = #tpu.dot_dimension_numbers<[0], [0], [1], [1], [0, 1, 1, 1], [], []>} : vector<8x256xbf16>, vector<8x128xbf16>, vector<256x128xf32> -> vector<256x128xf32>
    %cst_14 = arith.constant dense<0xFF800000> : vector<128xf32>
    %23 = vector.multi_reduction <maximumf>, %22, %cst_14 [0] : vector<256x128xf32> to vector<128xf32>
    %24 = vector.shape_cast %23 : vector<128xf32> to vector<1x128xf32>
    %25 = vector.broadcast %24 : vector<1x128xf32> to vector<256x128xf32>
    %26 = arith.subf %22, %25 : vector<256x128xf32>
    %27 = math.exp %26 : vector<256x128xf32>
    %cst_15 = arith.constant dense<0.000000e+00> : vector<128xf32>
    %28 = vector.multi_reduction <add>, %27, %cst_15 [0] : vector<256x128xf32> to vector<128xf32>
    %29 = vector.shape_cast %28 : vector<128xf32> to vector<1x128xf32>
    %30 = arith.truncf %27 : vector<256x128xf32> to vector<256x128xbf16>
    %cst_16 = arith.constant dense<0.000000e+00> : vector<8x128xf32>
    %31 = tpu.matmul %21, %30, %cst_16 {dimension_numbers = #tpu.dot_dimension_numbers<[1], [0], [0], [1], [0, 0, 1, 1], [], []>} : vector<8x256xbf16>, vector<256x128xbf16>, vector<8x128xf32> -> vector<8x128xf32>
    %32 = tpu.reciprocal %29 {approx = true} : vector<1x128xf32> -> vector<1x128xf32>
    %33 = vector.broadcast %32 : vector<1x128xf32> to vector<8x128xf32>
    %34 = arith.mulf %31, %33 : vector<8x128xf32>
    %35 = vector.extract_strided_slice %10 {offsets = [8, 0], sizes = [8, 128], strides = [1, 1]} : vector<32x128xf32> to vector<8x128xf32>
    %36 = arith.truncf %35 : vector<8x128xf32> to vector<8x128xbf16>
    %37 = vector.extract_strided_slice %15 {offsets = [8, 0], sizes = [8, 256], strides = [1, 1]} : vector<64x256xf32> to vector<8x256xf32>
    %38 = arith.truncf %37 : vector<8x256xf32> to vector<8x256xbf16>
    %39 = vector.extract_strided_slice %15 {offsets = [40, 0], sizes = [8, 256], strides = [1, 1]} : vector<64x256xf32> to vector<8x256xf32>
    %40 = arith.truncf %39 : vector<8x256xf32> to vector<8x256xbf16>
    %cst_17 = arith.constant dense<0.000000e+00> : vector<256x128xf32>
    %41 = tpu.matmul %38, %36, %cst_17 {dimension_numbers = #tpu.dot_dimension_numbers<[0], [0], [1], [1], [0, 1, 1, 1], [], []>} : vector<8x256xbf16>, vector<8x128xbf16>, vector<256x128xf32> -> vector<256x128xf32>
    %cst_18 = arith.constant dense<0xFF800000> : vector<128xf32>
    %42 = vector.multi_reduction <maximumf>, %41, %cst_18 [0] : vector<256x128xf32> to vector<128xf32>
    %43 = vector.shape_cast %42 : vector<128xf32> to vector<1x128xf32>
    %44 = vector.broadcast %43 : vector<1x128xf32> to vector<256x128xf32>
    %45 = arith.subf %41, %44 : vector<256x128xf32>
    %46 = math.exp %45 : vector<256x128xf32>
    %cst_19 = arith.constant dense<0.000000e+00> : vector<128xf32>
    %47 = vector.multi_reduction <add>, %46, %cst_19 [0] : vector<256x128xf32> to vector<128xf32>
    %48 = vector.shape_cast %47 : vector<128xf32> to vector<1x128xf32>
    %49 = arith.truncf %46 : vector<256x128xf32> to vector<256x128xbf16>
    %cst_20 = arith.constant dense<0.000000e+00> : vector<8x128xf32>
    %50 = tpu.matmul %40, %49, %cst_20 {dimension_numbers = #tpu.dot_dimension_numbers<[1], [0], [0], [1], [0, 0, 1, 1], [], []>} : vector<8x256xbf16>, vector<256x128xbf16>, vector<8x128xf32> -> vector<8x128xf32>
    %51 = tpu.reciprocal %48 {approx = true} : vector<1x128xf32> -> vector<1x128xf32>
    %52 = vector.broadcast %51 : vector<1x128xf32> to vector<8x128xf32>
    %53 = arith.mulf %50, %52 : vector<8x128xf32>
    %54 = vector.extract_strided_slice %10 {offsets = [16, 0], sizes = [8, 128], strides = [1, 1]} : vector<32x128xf32> to vector<8x128xf32>
    %55 = arith.truncf %54 : vector<8x128xf32> to vector<8x128xbf16>
    %56 = vector.extract_strided_slice %15 {offsets = [16, 0], sizes = [8, 256], strides = [1, 1]} : vector<64x256xf32> to vector<8x256xf32>
    %57 = arith.truncf %56 : vector<8x256xf32> to vector<8x256xbf16>
    %58 = vector.extract_strided_slice %15 {offsets = [48, 0], sizes = [8, 256], strides = [1, 1]} : vector<64x256xf32> to vector<8x256xf32>
    %59 = arith.truncf %58 : vector<8x256xf32> to vector<8x256xbf16>
    %cst_21 = arith.constant dense<0.000000e+00> : vector<256x128xf32>
    %60 = tpu.matmul %57, %55, %cst_21 {dimension_numbers = #tpu.dot_dimension_numbers<[0], [0], [1], [1], [0, 1, 1, 1], [], []>} : vector<8x256xbf16>, vector<8x128xbf16>, vector<256x128xf32> -> vector<256x128xf32>
    %cst_22 = arith.constant dense<0xFF800000> : vector<128xf32>
    %61 = vector.multi_reduction <maximumf>, %60, %cst_22 [0] : vector<256x128xf32> to vector<128xf32>
    %62 = vector.shape_cast %61 : vector<128xf32> to vector<1x128xf32>
    %63 = vector.broadcast %62 : vector<1x128xf32> to vector<256x128xf32>
    %64 = arith.subf %60, %63 : vector<256x128xf32>
    %65 = math.exp %64 : vector<256x128xf32>
    %cst_23 = arith.constant dense<0.000000e+00> : vector<128xf32>
    %66 = vector.multi_reduction <add>, %65, %cst_23 [0] : vector<256x128xf32> to vector<128xf32>
    %67 = vector.shape_cast %66 : vector<128xf32> to vector<1x128xf32>
    %68 = arith.truncf %65 : vector<256x128xf32> to vector<256x128xbf16>
    %cst_24 = arith.constant dense<0.000000e+00> : vector<8x128xf32>
    %69 = tpu.matmul %59, %68, %cst_24 {dimension_numbers = #tpu.dot_dimension_numbers<[1], [0], [0], [1], [0, 0, 1, 1], [], []>} : vector<8x256xbf16>, vector<256x128xbf16>, vector<8x128xf32> -> vector<8x128xf32>
    %70 = tpu.reciprocal %67 {approx = true} : vector<1x128xf32> -> vector<1x128xf32>
    %71 = vector.broadcast %70 : vector<1x128xf32> to vector<8x128xf32>
    %72 = arith.mulf %69, %71 : vector<8x128xf32>
    %73 = vector.extract_strided_slice %10 {offsets = [24, 0], sizes = [8, 128], strides = [1, 1]} : vector<32x128xf32> to vector<8x128xf32>
    %74 = arith.truncf %73 : vector<8x128xf32> to vector<8x128xbf16>
    %75 = vector.extract_strided_slice %15 {offsets = [24, 0], sizes = [8, 256], strides = [1, 1]} : vector<64x256xf32> to vector<8x256xf32>
    %76 = arith.truncf %75 : vector<8x256xf32> to vector<8x256xbf16>
    %77 = vector.extract_strided_slice %15 {offsets = [56, 0], sizes = [8, 256], strides = [1, 1]} : vector<64x256xf32> to vector<8x256xf32>
    %78 = arith.truncf %77 : vector<8x256xf32> to vector<8x256xbf16>
    %cst_25 = arith.constant dense<0.000000e+00> : vector<256x128xf32>
    %79 = tpu.matmul %76, %74, %cst_25 {dimension_numbers = #tpu.dot_dimension_numbers<[0], [0], [1], [1], [0, 1, 1, 1], [], []>} : vector<8x256xbf16>, vector<8x128xbf16>, vector<256x128xf32> -> vector<256x128xf32>
    %cst_26 = arith.constant dense<0xFF800000> : vector<128xf32>
    %80 = vector.multi_reduction <maximumf>, %79, %cst_26 [0] : vector<256x128xf32> to vector<128xf32>
    %81 = vector.shape_cast %80 : vector<128xf32> to vector<1x128xf32>
    %82 = vector.broadcast %81 : vector<1x128xf32> to vector<256x128xf32>
    %83 = arith.subf %79, %82 : vector<256x128xf32>
    %84 = math.exp %83 : vector<256x128xf32>
    %cst_27 = arith.constant dense<0.000000e+00> : vector<128xf32>
    %85 = vector.multi_reduction <add>, %84, %cst_27 [0] : vector<256x128xf32> to vector<128xf32>
    %86 = vector.shape_cast %85 : vector<128xf32> to vector<1x128xf32>
    %87 = arith.truncf %84 : vector<256x128xf32> to vector<256x128xbf16>
    %cst_28 = arith.constant dense<0.000000e+00> : vector<8x128xf32>
    %88 = tpu.matmul %78, %87, %cst_28 {dimension_numbers = #tpu.dot_dimension_numbers<[1], [0], [0], [1], [0, 0, 1, 1], [], []>} : vector<8x256xbf16>, vector<256x128xbf16>, vector<8x128xf32> -> vector<8x128xf32>
    %89 = tpu.reciprocal %86 {approx = true} : vector<1x128xf32> -> vector<1x128xf32>
    %90 = vector.broadcast %89 : vector<1x128xf32> to vector<8x128xf32>
    %91 = arith.mulf %88, %90 : vector<8x128xf32>
    %92 = tpu.concatenate %34, %53, %72, %91 in 0 : vector<8x128xf32>, vector<8x128xf32>, vector<8x128xf32>, vector<8x128xf32> -> vector<32x128xf32>
    %93 = arith.truncf %92 : vector<32x128xf32> to vector<32x128xbf16>
    %c0_29 = arith.constant 0 : index
    %c0_30 = arith.constant 0 : index
    %94 = vector.load %arg6[%c0_29, %c0_30] : memref<32x32xbf16, #tpu.memory_space<vmem>>, vector<32x32xbf16>
    %cst_31 = arith.constant dense<0.000000e+00> : vector<32x128xf32>
    %95 = tpu.matmul %94, %93, %cst_31 {dimension_numbers = #tpu.dot_dimension_numbers<[1], [0], [0], [1], [0, 0, 1, 1], [], []>} : vector<32x32xbf16>, vector<32x128xbf16>, vector<32x128xf32> -> vector<32x128xf32>
    %c0_32 = arith.constant 0 : index
    %c0_33 = arith.constant 0 : index
    %96 = vector.load %arg7[%c0_32, %c0_33] : memref<32x1xf32, #tpu.memory_space<vmem>>, vector<32x1xf32>
    %97 = vector.broadcast %96 : vector<32x1xf32> to vector<32x128xf32>
    %98 = arith.addf %95, %97 : vector<32x128xf32>
    %c0_34 = arith.constant 0 : index
    %c0_35 = arith.constant 0 : index
    %c0_36 = arith.constant 0 : index
    %99 = vector.load %arg8[%c0_34, %c0_35, %c0_36] : memref<1x32x128xf32, #tpu.memory_space<vmem>>, vector<1x32x128xf32>
    %100 = vector.shape_cast %99 : vector<1x32x128xf32> to vector<32x128xf32>
    %101 = vector.shape_cast %98 : vector<32x128xf32> to vector<1x32x128xf32>
    tpu.vector_store %arg8[%c0_34, %c0_35, %c0_36], %101 {strides = array<i32>} : memref<1x32x128xf32, #tpu.memory_space<vmem>>, vector<1x32x128xf32>,
    return
  }
  func.func @transform_0(%arg0: i32, %arg1: i32) -> (i32, i32, i32) {
    %c0_i32 = arith.constant 0 : i32
    %c0_i32_0 = arith.constant 0 : i32
    return %arg0, %c0_i32, %arg1 : i32, i32, i32
  }
  func.func @transform_1(%arg0: i32, %arg1: i32) -> (i32, i32, i32) {
    %c0_i32 = arith.constant 0 : i32
    %c0_i32_0 = arith.constant 0 : i32
    %c0_i32_1 = arith.constant 0 : i32
    return %arg0, %c0_i32, %c0_i32_0 : i32, i32, i32
  }
  func.func @transform_2(%arg0: i32, %arg1: i32) -> (i32, i32) {
    %c0_i32 = arith.constant 0 : i32
    %c0_i32_0 = arith.constant 0 : i32
    %c0_i32_1 = arith.constant 0 : i32
    return %c0_i32, %c0_i32_0 : i32, i32
  }
  func.func @transform_3(%arg0: i32, %arg1: i32) -> (i32, i32) {
    %c0_i32 = arith.constant 0 : i32
    %c0_i32_0 = arith.constant 0 : i32
    %c0_i32_1 = arith.constant 0 : i32
    return %c0_i32, %c0_i32_0 : i32, i32
  }
  func.func @transform_4(%arg0: i32, %arg1: i32) -> (i32, i32) {
    %c0_i32 = arith.constant 0 : i32
    %c0_i32_0 = arith.constant 0 : i32
    %c0_i32_1 = arith.constant 0 : i32
    return %c0_i32, %c0_i32_0 : i32, i32
  }
  func.func @transform_5(%arg0: i32, %arg1: i32) -> (i32, i32) {
    %c0_i32 = arith.constant 0 : i32
    %c0_i32_0 = arith.constant 0 : i32
    %c0_i32_1 = arith.constant 0 : i32
    return %c0_i32, %c0_i32_0 : i32, i32
  }
  func.func @transform_6(%arg0: i32, %arg1: i32) -> (i32, i32, i32) {
    %c0_i32 = arith.constant 0 : i32
    %c0_i32_0 = arith.constant 0 : i32
    return %arg0, %c0_i32, %arg1 : i32, i32, i32
  }
}

</mosaic_0001>

<bundles_post_ra>
// kernel: tpu_custom_call.1
= control target key start
LH: loop header
LB: loop body
LE: loop exit
PB: predicated region body
PF: predicated region fallthrough
CT: control target
= control target key end

     0   :  { %s5474_s0 = inlined_call_operand.vmem [shape: f32[2,32,256], index: 0, kind: input, shape index: {}]   ;;  %s5475_s1 = inlined_call_operand.hbm [shape: f32[2,32,256], index: 1, kind: input, shape index: {}]   ;;  %s5476_s2 = inlined_call_operand.vmem [shape: bf16[96,32], index: 2, kind: input, shape index: {}]   ;;  %s5477_s3 = inlined_call_operand.vmem [shape: f32[96,1], index: 3, kind: input, shape index: {}]   ;;  %s5478_s4 = inlined_call_operand.vmem [shape: bf16[32,32], index: 4, kind: input, shape index: {}]   ;;  %s5479_s5 = inlined_call_operand.vmem [shape: f32[32,1], index: 5, kind: input, shape index: {}]   ;;  %s5480_s6 = inlined_call_operand.hbm [shape: f32[2,32,256], index: 6, kind: output, shape index: {}]  }
   0x1   :  { %5485 = sst [smem:[#allocation39_spill]] %s5474_s0 }
   0x2   :  { %11 = vsyncpa [#allocation4], 0 }
   0x3   :  { %13 = vsyncpa [#allocation4 + $0x1], 0 }
   0x4   :  { %14 = vsyncpa [#allocation5], 0 }
   0x5   :  { %16 = vsyncpa [#allocation5 + $0x1], 0  ;;  %s3750_s21 = smov 0   ;;  %s3752_s22 = smov 0  }
   0x6   :  { %s3754_s23 = smov 0   ;;  %s3756_s24 = smov 0  }
   0x7   :  { %s3758_s25 = smov 0   ;;  %s3760_s26 = smov 0  }
   0x8   :  { %s3762_s27 = smov 0   ;;  %s3764_s28 = smov 0  }
   0x9   :  { %s3766_s29 = smov 0   ;;  %s3768_s30 = smov 0  }
   0xa   :  { %s3770_s7 = smov 0  }
   0xb LB: > { %5486 = sst [smem:[#allocation9_spill]] %s3697_s29  ;;  %s2758_s8 = sadd.s32 4294967295, %s3705_s7   ;;  %s3705_s7 = sphi %s3770_s7, %s22_s7   ;;  %s3701_s30 = sphi %s3768_s30, %s5580_s30   ;;  %s3697_s29 = sphi %s3766_s29, %s5571_s29   ;;  %s3693_s28 = sphi %s3764_s28, %s5579_s28   ;;  %s3689_s27 = sphi %s3762_s27, %s5570_s27   ;;  %s3685_s26 = sphi %s3760_s26, %s5578_s26   ;;  %s3681_s25 = sphi %s3758_s25, %s5577_s25   ;;  %s3677_s24 = sphi %s3756_s24, %s5576_s24   ;;  %s3673_s23 = sphi %s3754_s23, %s5575_s23   ;;  %s3669_s22 = sphi %s3752_s22, %s5574_s22   ;;  %s3665_s21 = sphi %s3750_s21, %s5573_s21  }
   0xc   : > { %s2759_s9 = sadd.s32 4294967294, %s3705_s7   ;;  %s31_s10 = sadd.s32 1, %s3697_s29 }
   0xd   : > { %s34_s11 = sadd.s32 1, %s3701_s30  ;;  %p32_p0 = scmp.ge.s32.totalorder %s31_s10, 2 }
   0xe   : > { %s43_s12 = sadd.s32 1, %s3685_s26  ;;  %p50_p1 = scmp.ne.s32.totalorder %s3685_s26, %s3681_s25 }
   0xf   : > { %p51_p2 = scmp.eq.s32.totalorder %s3705_s7, 0  ;;  %s5582_s10 = smov (%p32_p0, %s31_s10), 0 }
  0x10   : > { %5487 = sst [smem:[#allocation10_spill]] %s5582_s10  ;;  %s5584_s11 = smov (!%p32_p0, %s34_s11), %s3701_s30 }
  0x11   : > { %s39_s13 = ssub.s32 %s3697_s29, %s5582_s10  ;;  %p3821_p3 = por %p51_p2, %p50_p1 }
  0x12   : > { %p36_p4 = scmp.ge.s32.totalorder %s5584_s11, 2  ;;  %s69_s15 = sadd.s32 1, %s3677_s24 }
  0x13   : > { %p76_p5 = scmp.ne.s32.totalorder %s3677_s24, %s3673_s23  ;;  %p82_p6 = scmp.ne.s32.totalorder %s3673_s23, %s3669_s22 }
  0x14   : > { %s5586_s11 = smov (%p36_p4, %s5584_s11), 0  ;;  %p83_p8 = scmp.eq.s32.totalorder %s2758_s8, 0 }
  0x15   : > { %5489 = sst [smem:[#allocation11_spill]] %s5586_s11  ;;  %p3832_p7 = por %p76_p5, %p51_p2 }
  0x16   : > { %s38_s17 = ssub.s32 %s3701_s30, %s5586_s11  ;;  %p192_p9 = scmp.eq.s32.totalorder %s2758_s8, 3 }
  0x17   : > { %s40_s18 = sor.u32 %s39_s13, %s38_s17  ;;  %p67_p10 = scmp.eq.s32.totalorder %s38_s17, 0 }
  0x18   : > { %p41_p11 = scmp.eq.s32.totalorder %s40_s18, 0  ;;  %p3838_p12 = por %p83_p8, %p82_p6 }
  0x19   : > { %s3843_s20 = scalar_select %p67_p10, %s3677_s24, %s69_s15  }
  0x1a   : > { %s3846_s22 = scalar_select %p41_p11, %s3685_s26, %s43_s12  }
  0x1b   : > { %5492 = sst [smem:[#allocation12_spill]] %s3843_s20  ;;  %p3851_p13 = por %p192_p9, %p50_p1 }
  0x1c   : > { %5493 = sst [smem:[#allocation13_spill]] %s3846_s22  ;;  %p197_p0 = scmp.ne.s32.totalorder %s3681_s25, %s3665_s21 }
  0x1d   : > { %s5494_s10 = scalar_select %p3851_p13, 1, 0 }
  0x1e   : > { %p198_p2 = scmp.eq.s32.totalorder %s2759_s9, 3  ;;  %p2761_p5 = scmp.ge.s32.totalorder %s3705_s7, 4 }
  0x20   : > { %p3857_p4 = por %p198_p2, %p197_p0  ;;  %226 = sbr.rel (%p2761_p5) target bundleno = 77 (0x4d), region = 32 }
  0x22   : > { %s5495_s8 = scalar_select %p3857_p4, 1, 0 }
  0x27   : > { %229 = sbr.rel (!%p3821_p3) target bundleno = 51 (0x33), region = 36  ;;  %s231_s12 = sand.u32 (%p3821_p3), 1, %s3685_s26  }
  0x28   : > { %s2763_s13 = sshll.u32 (%p3821_p3), %s3701_s30, 3  ;;  %s2762_s15 = sshll.u32 (%p3821_p3), %s231_s12, 5 }
  0x29   : > { %s235_s17 = sadd.s32 (%p3821_p3), %s3697_s29, %s2763_s13  ;;  %s5496_s0 = sld [smem:[#allocation39_spill]] (%p3821_p3) }
  0x2a   : > { %s2764_s18 = sshll.u32 (%p3821_p3), %s235_s17, 3  ;;  %s233_s20 = scalar_lea.vmem (%p3821_p3), [#allocation2], %s2762_s15 }
  0x2f   : > { %s237_s22 = scalar_lea.vmem %s5496_s0, %s2764_s18 }
  0x30   : > { %v271_v0 = vld [vmem:[%s237_s22] sm:$0xff]  ;;  %v273_v1 = vld [vmem:[%s237_s22 + $0x10] sm:$0xff] }
  0x31   : > { %v275_v2 = vld [vmem:[%s237_s22 + $0x20] sm:$0xff]  ;;  %272 = vst [vmem:[%s233_s20] sm:$0xff] %v271_v0  ;;  %274 = vst [vmem:[%s233_s20 + $0x8] sm:$0xff] %v273_v1  ;;  %v277_v3 = vld [vmem:[%s237_s22 + $0x30] sm:$0xff] }
  0x32   : > { %276 = vst [vmem:[%s233_s20 + $0x10] sm:$0xff] %v275_v2  ;;  %278 = vst [vmem:[%s233_s20 + $0x18] sm:$0xff] %v277_v3 }
  0x33 PF: > { %s285_s14 = sand.u32 1, %s3677_s24   ;;  %s2857_s12 = sshll.u32 %s3701_s30, 10 }
  0x34   : > { %s2765_s13 = sshll.u32 %s285_s14, 6  ;;  %s3875_s11 = scalar_lea.hbm %s5475_s1, %s2857_s12 }
  0x35   : > { %s289_s15 = scalar_lea.vmem [#allocation3], %s2765_s13  ;;  %s3879_s20 = scalar_lea.sflag [#allocation4], %s285_s14 }
  0x36   : > { %s296_s18 = sshll.u32 %s289_s15, 4  ;;  %s3555_s22 = scalar_lea.hbm %s3875_s11, 1024  ;;  %s3877_s18 = int_to_ptr.vmem [resolvable:$true] %s296_s18 }
  0x37   : > { %p3556_p1 = scmp.ne.s32.totalorder %s3875_s11, %s3555_s22  ;;  %s3559_s29 = scalar_lea.hbm %s5475_s1, 2048 }
  0x38   : > { %p3560_p8 = scmp.lt.u32.totalorder %s3875_s11, %s5475_s1  ;;  %p3561_p9 = scmp.lt.u32.totalorder %s3559_s29, %s3555_s22 }
  0x39   : > { %p3557_p3 = pnand %p3556_p1, %p3832_p7  ;;  %p3563_p11 = scmp.lt.u32.totalorder %s3555_s22, %s3875_s11 }
  0x3a   : > { %p3562_p10 = por %p3561_p9, %p3560_p8 }
  0x3b   : > { %p3558_p6 = pneg %p3557_p3 }
  0x3c   : > { %p3564_p0 = por %p3563_p11, %p3562_p10 }
  0x3e   : > { %p3565_p2 = pnand %p3564_p0, %p3558_p6 }
  0x40   : > { %3568 = shalt.err (!%p3565_p2)
}
  0x41   : > { %s3569_s14 = scalar_lea.vmem %s3877_s18, 1024  ;;  %s3707_s0 = smov [#allocation3]  }
  0x42   : > { %p3570_p5 = scmp.ne.s32.totalorder %s3877_s18, %s3569_s14  ;;  %s3573_s13 = sshll.u32 %s3707_s0, 4  ;;  %s3574_s13 = int_to_ptr.vmem [resolvable:$false] %s3573_s13 }
  0x43   : > { %s3575_s15 = scalar_lea.vmem %s3574_s13, 2048  ;;  %p3576_p4 = scmp.lt.s32.totalorder %s3877_s18, %s3574_s13 }
  0x44   : > { %p3571_p1 = pnand %p3570_p5, %p3832_p7  ;;  %p3577_p13 = scmp.lt.s32.totalorder %s3575_s15, %s3569_s14 }
  0x46   : > { %p3572_p3 = pneg %p3571_p1  ;;  %p3578_p8 = por %p3577_p13, %p3576_p4 }
  0x48   : > { %p3579_p9 = pnand %p3578_p8, %p3572_p3 }
  0x4a   : > { %3582 = shalt.err (!%p3579_p9)
}
  0x4b   : > { %s3708_s22 = smov 256   ;;  %s3709_s9 = smov 16  }
  0x4c   : > { %3178 = dma.hbm_to_vmem [thread:$0]  (%p3832_p7), %s3875_s11, 1024, %s3877_s18, %s3879_s20, %s3708_s22, %s3708_s22, %s3709_s9  }
  0x4d PF: > { %p2768_p6 = scmp.ge.s32.totalorder %s3705_s7, 1  ;;  %p304_p10 = scmp.lt.s32.totalorder %s3705_s7, 5 }
  0x4f   : > { %p305_p11 = pnand %p2768_p6, %p304_p10 }
  0x51   : > { %308 = sbr.rel (%p305_p11) target bundleno = 2347 (0x92b), region = 78 }
  0x58   : > { %s311_s29 = sand.u32 1, %s3681_s25   ;;  %s317_s12 = sand.u32 1, %s3673_s23  }
  0x59   : > { %s3909_s17 = sshll.u32 %s311_s29, 5  ;;  %s2770_s14 = sshll.u32 %s317_s12, 6 }
  0x5a   : > { %s313_s16 = scalar_lea.vmem [#allocation2], %s3909_s17  ;;  %s318_s11 = scalar_lea.sflag [#allocation4], %s317_s12 }
  0x5b   : > { %s321_s18 = scalar_lea.vmem [#allocation3], %s2770_s14 }
  0x5c   : > { %3656 = dma.done.wait (%p3838_p12), %s318_s11, 1024  }
  0x5d   : > { %3658 = vsyncadd (%p3838_p12), %s318_s11, 4294966272  ;;  %v3710_v4 = vmov 0   ;;  %v355_v5 = vld [vmem:[%s313_s16] sm:$0xff]  ;;  %v356_v6 = vld [vmem:[%s313_s16 + $0x8] sm:$0xff]  ;;  %vm411_vm0 = vcmask 261120   ;;  %vm714_vm1 = vcmask 1043456  }
  0x5e   : > { %587 = vmatprep.mubr.bf16.mxu1 %v3710_v4  ;;  %3281 = vset.pattern.permute.xlu0 %v3710_v4  ;;  %v362_v7 = vld [vmem:[%s321_s18 + $0x8] sm:$0xff]  ;;  %v359_v8 = vpack.c.bf16 %v356_v6, %v355_v5  ;;  %v364_v9 = vld [vmem:[%s321_s18 + $0x18] sm:$0xff]  ;;  %v361_v10 = vld [vmem:[%s321_s18] sm:$0xff]  ;;  %vm665_vm2 = vcmask 64512   ;;  %s2853_s19 = sshll.u32 %s3693_s28, 3  ;;  %s353_s0 = scalar_lea.vmem [#allocation6], %s3909_s17 }
  0x5f   : > { %v363_v11 = vld [vmem:[%s321_s18 + $0x10] sm:$0xff]  ;;  %v370_v12 = vpack.c.bf16 %v364_v9, %v362_v7  ;;  %v358_v15 = vld [vmem:[%s313_s16 + $0x18] sm:$0xff]  ;;  %v366_v16 = vld [vmem:[%s321_s18 + $0x28] sm:$0xff]  ;;  %s2649_s20 = sadd.s32 %s3689_s27, %s2853_s19  ;;  %s2652_s13 = sshll.u32 %s353_s0, 4  ;;  %s5404_s13 = int_to_ptr.vmem [resolvable:$true] %s2652_s13 }
  0x60   : > { %v369_v13 = vpack.c.bf16 %v363_v11, %v361_v10  ;;  %v357_v14 = vld [vmem:[%s313_s16 + $0x10] sm:$0xff]  ;;  %3022 = vmatprep.subr.bf16.mxu0 %v359_v8  ;;  %v368_v18 = vld [vmem:[%s321_s18 + $0x38] sm:$0xff]  ;;  %v365_v19 = vld [vmem:[%s321_s18 + $0x20] sm:$0xff]  ;;  %s2854_s15 = sshll.u32 %s2649_s20, 7  ;;  %s5413_s22 = scalar_lea.sflag [#allocation5], %s311_s29 }
  0x61   : > { %v360_v17 = vpack.c.bf16 %v358_v15, %v357_v14  ;;  %v367_v20 = vld [vmem:[%s321_s18 + $0x30] sm:$0xff]  ;;  %555 = vmatprep.subr.bf16.mxu1 %v370_v12  ;;  %3023 = vmatpush3.bf16.msra.mxu0 %v359_v8  ;;  %v372_v21 = vpack.c.bf16 %v368_v18, %v366_v16  ;;  %v3283_v22 = vld [vmem:[%s5476_s2] sm:$0xff]   ;;  %v3284_v24 = vld [vmem:[%s5476_s2 + $0x8] sm:$0xff]   ;;  %s5409_s17 = scalar_lea.hbm %s5480_s6, %s2854_s15  ;;  %s3583_s9 = scalar_lea.vmem %s5404_s13, 512 }
  0x62   : > { %556 = vmatpush1.bf16.msra.mxu1 %v369_v13  ;;  %v371_v23 = vpack.c.bf16 %v367_v20, %v365_v19  ;;  %3026 = vmatprep.mubr.msk.bf16.mxu0 %vm411_vm0, %v3283_v22  ;;  %v3285_v25 = vld [vmem:[%s5476_s2 + $0x10] sm:$0xff]   ;;  %v475_v26 = vld [vmem:[%s5477_s3 + $0x20] sm:$0xff]  ;;  %v476_v28 = vld [vmem:[%s5477_s3 + $0x28] sm:$0xff]  ;;  %p3584_p7 = scmp.ne.s32.totalorder %s5404_s13, %s3583_s9  ;;  %p5566_p12 = scmp.ne.s32.totalorder %s5494_s10, 0 }
  0x63   : > { %3024 = vmatprep.subr.bf16.mxu0 %v360_v17  ;;  %557 = vmatprep.subr.bf16.mxu1 %v372_v21  ;;  %v377_v27 = vld [vmem:[%s5477_s3] sm:$0xff]  ;;  %v3286_v29 = vld [vmem:[%s5476_s2 + $0x18] sm:$0xff]   ;;  %v378_v31 = vld [vmem:[%s5477_s3 + $0x8] sm:$0xff]  ;;  %s3711_s12 = smov [#allocation6]  }
  0x64   : > { %485 = vperm.xlu0 %3281, %v475_v26   ;;  %v479_v30 = vld [vmem:[%s5477_s3 + $0x40] sm:$0xff]  ;;  %v3288_v33 = vld [vmem:[%s5476_s2 + $0x28] sm:$0xff]   ;;  %v477_v63 = vld [vmem:[%s5477_s3 + $0x30] sm:$0xff]  ;;  %p3585_p13 = pnand %p3584_p7, %p5566_p12  ;;  %s3587_s14 = sshll.u32 %s3711_s12, 4  ;;  %s3588_s14 = int_to_ptr.vmem [resolvable:$false] %s3587_s14 }
  0x65   : > { %3025 = vmatpush3.bf16.msra.mxu0 %v360_v17  ;;  %v3287_v32 = vld [vmem:[%s5476_s2 + $0x20] sm:$0xff]   ;;  %v379_v0 = vld [vmem:[%s5477_s3 + $0x10] sm:$0xff]  ;;  %v480_v3 = vld [vmem:[%s5477_s3 + $0x48] sm:$0xff]  ;;  %s3589_s16 = scalar_lea.vmem %s3588_s14, 1024  ;;  %p3590_p0 = scmp.lt.s32.totalorder %s5404_s13, %s3588_s14 }
  0x66   : > { %558 = vmatpush1.bf16.msra.mxu1 %v371_v23  ;;  %p3586_p4 = pneg %p3585_p13  ;;  %p3591_p2 = scmp.lt.s32.totalorder %s3589_s16, %s3583_s9 }
  0x68   : > { %3027 = vmatmul.mubr.msk.bf16.vlgmr.msra.gmra.mrb[0].mxu0 %vm411_vm0, %v3284_v24  ;;  %383 = vperm.xlu0 %3281, %v377_v27   ;;  %p3592_p5 = por %p3591_p2, %p3590_p0 }
  0x69   : > { %2780 = vmatmul.mubr.msk.bf16.vlgmr.msra.gmra.mrb[0].mxu1 %vm411_vm0, %v3285_v25 }
  0x6a   : > { %597 = vmatprep.mubr.bf16.mxu1 %v3710_v4  ;;  %p3593_p1 = pnand %p3592_p5, %p3586_p4 }
  0x6c   : > { %490 = vperm.xlu0 %3281, %v476_v28  }
  0x70   : > { %505 = vperm.xlu0 %3281, %v479_v30  }
  0x71   : > { %2781 = vmatmul.mubr.msk.bf16.gmra.mrb[4].mxu1 %vm411_vm0, %v3286_v29 }
  0x72   : > { %607 = vmatprep.mubr.bf16.mxu1 %v3710_v4 }
  0x74   : > { %388 = vperm.xlu0 %3281, %v378_v31  }
  0x79   : > { %2782 = vmatmul.mubr.msk.bf16.gmra.mrb[8].mxu1 %vm411_vm0, %v3287_v32 }
  0x7a   : > { %617 = vmatprep.mubr.bf16.mxu1 %v3710_v4 }
  0x81   : > { %2783 = vmatmul.mubr.msk.bf16.gmra.mrb[12].mxu1 %vm411_vm0, %v3288_v33 }
  0xe3   : > { %v486_v34 = vpop.permute.xlu0 %485 }
  0xe7   : > { %v384_v35 = vpop.permute.xlu0 %383 }
  0xeb   : > { %v491_v36 = vpop.permute.xlu0 %490 }
  0xef   : > { %v3978_v57 = vpop.permute.xlu0 %505 }
  0xf3   : > { %v3994_v8 = vpop.permute.xlu0 %388 }
 0x13b   : > { %v3960_v37 = vpop.f32.mrb[0].mxu0 }
 0x13c   : > { %5497 = vst [vmem:[#allocation14_spill] sm:$0xff] %v3960_v37  ;;  %v589_v38 = vpop.f32.mrb[0].mxu1  ;;  %v452_v39 = vpop.f32.mrb[1].mxu0 }
 0x13d   : > { %v453_v40 = vadd.f32 %v452_v39, %v384_v35  ;;  %v591_v41 = vpop.f32.mrb[1].mxu1  ;;  %v3962_v42 = vpop.f32.mrb[2].mxu0  ;;  %v590_v43 = vadd.f32 %v589_v38, %v486_v34  ;;  %v478_v35 = vld [vmem:[%s5477_s3 + $0x38] sm:$0xff] }
 0x13e   : > { %5498 = vst [vmem:[#allocation15_spill] sm:$0xff] %v3962_v42  ;;  %v593_v44 = vpop.f32.mrb[2].mxu1  ;;  %v3964_v45 = vpop.f32.mrb[3].mxu0  ;;  %v592_v61 = vadd.f32 %v591_v41, %v486_v34  ;;  %v481_v34 = vld [vmem:[%s5477_s3 + $0x50] sm:$0xff] }
 0x13f   : > { %v628_v46 = vpack.c.bf16 %v453_v40, %v453_v40  ;;  %v594_v47 = vadd.f32 %v593_v44, %v491_v36  ;;  %v595_v48 = vpop.f32.mrb[3].mxu1  ;;  %v629_v49 = vpack.c.bf16 %v590_v43, %v590_v43 }
 0x140   : > { %v630_v62 = vpack.c.bf16 %v592_v61, %v592_v61  ;;  %v596_v1 = vadd.f32 %v595_v48, %v491_v36  ;;  %v380_v36 = vld [vmem:[%s5477_s3 + $0x18] sm:$0xff] }
 0x141   : > { %v716_v50 = vsel %vm714_vm1, %v628_v46, 0  ;;  %v1108_v51 = vpack.c.bf16 %v594_v47, %v594_v47  ;;  %633 = vxpose.xlu1.c.b16.start.end [1/1] (short) %v629_v49, 128  ;;  %3174 = vmatprep.subr.msk.bf16.mxu0 %vm714_vm1, %v628_v46 }
 0x142   : > { %3031 = vmatpush3.bf16.msra.mxu0 %v716_v50  ;;  %v1109_v2 = vpack.c.bf16 %v596_v1, %v596_v1 }
 0x143   : > { %1112 = vxpose.xlu0.c.b16.start.end [1/1] (short) %v1108_v51, 128 }
 0x144   : > { %v3968_v52 = vpop.f32.mrb[4].mxu1 }
 0x145   : > { %v3970_v53 = vpop.f32.mrb[5].mxu1 }
 0x146   : > { %v3972_v54 = vpop.f32.mrb[6].mxu1 }
 0x147   : > { %v3974_v55 = vpop.f32.mrb[7].mxu1 }
 0x14c   : > { %v3976_v56 = vpop.f32.mrb[8].mxu1 }
 0x14d   : > { %v611_v58 = vpop.f32.mrb[9].mxu1 }
 0x14e   : > { %v612_v59 = vadd.f32 %v611_v58, %v3978_v57 }
 0x150   : > { %v632_v60 = vpack.c.bf16 %v612_v59, %v612_v59 }
 0x152   : > { %1097 = vmatprep.mubr.bf16.mxu1 %v632_v60 }
 0x15e   : > { %649 = vxpose.xlu1.c.b16.start.end [1/1] (short) %v630_v62, 128 }
 0x168   : > { %495 = vperm.xlu0 %3281, %v477_v63  }
 0x16c   : > { %393 = vperm.xlu0 %3281, %v379_v0  }
 0x17b   : > { %1128 = vxpose.xlu1.c.b16.start.end [1/1] (short) %v1109_v2, 128 }
 0x17f   : > { %3282 = vset.pattern.permute.xlu1 %v3710_v4 }
 0x19b   : > { %510 = vperm.xlu1 %3282, %v480_v3  }
 0x1a7   : > { %v641_v5 = vpop.trf.xlu1 }
 0x1a8   : > { %3032 = vmatprep.mubr.msk.bf16.mxu0 %vm665_vm2, %v641_v5 }
 0x1a9   : > { %v3997_v10 = vpop.trf.xlu0 }
 0x1ab   : > { %v642_v6 = vpop.trf.xlu1 }
 0x1ac   : > { %3033 = vmatmul.mubr.msk.bf16.vlgmr.msra.gmra.mrb[4].mxu0 %vm665_vm2, %v642_v6 }
 0x1ad   : > { %v4001_v12 = vpop.trf.xlu0 }
 0x1af   : > { %v643_v7 = vpop.trf.xlu1 }
 0x1b0   : > { %3036 = vmatprep.mubr.msk.bf16.mxu0 %vm665_vm2, %v643_v7 }
 0x1b1   : > { %v4004_v15 = vpop.trf.xlu0 }
 0x1b3   : > { %v644_v9 = vpop.trf.xlu1 }
 0x1b4   : > { %3037 = vmatmul.mubr.msk.bf16.gmra.mrb[8].mxu0 %vm665_vm2, %v644_v9 }
 0x1b5   : > { %v4008_v17 = vpop.trf.xlu0 }
 0x1b7   : > { %v645_v4 = vpop.trf.xlu1 }
 0x1b8   : > { %3040 = vmatprep.mubr.msk.bf16.mxu0 %vm665_vm2, %v645_v4 }
 0x1b9   : > { %v4011_v20 = vpop.trf.xlu0 }
 0x1bb   : > { %v646_v11 = vpop.trf.xlu1 }
 0x1bc   : > { %3041 = vmatmul.mubr.msk.bf16.gmra.mrb[12].mxu0 %vm665_vm2, %v646_v11 }
 0x1bd   : > { %v4015_v22 = vpop.trf.xlu0 }
 0x1bf   : > { %v647_v13 = vpop.trf.xlu1 }
 0x1c0   : > { %3044 = vmatprep.mubr.msk.bf16.mxu0 %vm665_vm2, %v647_v13 }
 0x1c1   : > { %v4018_v25 = vpop.trf.xlu0 }
 0x1c3   : > { %v648_v14 = vpop.trf.xlu1 }
 0x1c4   : > { %3045 = vmatmul.mubr.msk.bf16.gmra.mrb[16].mxu0 %vm665_vm2, %v648_v14 }
 0x1c5   : > { %v4022_v27 = vpop.trf.xlu0 }
 0x1c7   : > { %v657_v16 = vpop.trf.xlu1 }
 0x1c8   : > { %3048 = vmatprep.mubr.msk.bf16.mxu0 %vm665_vm2, %v657_v16 }
 0x1cb   : > { %v658_v18 = vpop.trf.xlu1 }
 0x1cc   : > { %3049 = vmatmul.mubr.msk.bf16.gmra.mrb[20].mxu0 %vm665_vm2, %v658_v18 }
 0x1cf   : > { %v659_v19 = vpop.trf.xlu1 }
 0x1d0   : > { %3052 = vmatprep.mubr.msk.bf16.mxu0 %vm665_vm2, %v659_v19 }
 0x1d3   : > { %v660_v21 = vpop.trf.xlu1 }
 0x1d4   : > { %3053 = vmatmul.mubr.msk.bf16.gmra.mrb[24].mxu0 %vm665_vm2, %v660_v21 }
 0x1d7   : > { %v661_v23 = vpop.trf.xlu1 }
 0x1d8   : > { %3056 = vmatprep.mubr.msk.bf16.mxu0 %vm665_vm2, %v661_v23 }
 0x1db   : > { %v662_v24 = vpop.trf.xlu1 }
 0x1dc   : > { %3057 = vmatmul.mubr.msk.bf16.gmra.mrb[28].mxu0 %vm665_vm2, %v662_v24 }
 0x1df   : > { %v663_v26 = vpop.trf.xlu1 }
 0x1e0   : > { %3060 = vmatprep.mubr.msk.bf16.mxu0 %vm665_vm2, %v663_v26 }
 0x1e3   : > { %v664_v28 = vpop.trf.xlu1 }
 0x1e4   : > { %3061 = vmatmul.mubr.msk.bf16.gmra.mrb[32].mxu0 %vm665_vm2, %v664_v28 }
 0x1e7   : > { %v496_v29 = vpop.permute.xlu0 %495  ;;  %v4048_v46 = vpop.trf.xlu1 }
 0x1e8   : > { %v600_v30 = vadd.f32 %v3968_v52, %v496_v29  ;;  %v602_v31 = vadd.f32 %v3970_v53, %v496_v29 }
 0x1ea   : > { %v1585_v32 = vpack.c.bf16 %v600_v30, %v600_v30  ;;  %v1586_v33 = vpack.c.bf16 %v602_v31, %v602_v31 }
 0x1eb   : > { %v4036_v38 = vpop.permute.xlu0 %393  ;;  %v4056_v50 = vpop.trf.xlu1 }
 0x1ec   : > { %1589 = vxpose.xlu0.c.b16.start.end [1/1] (short) %v1585_v32, 128  ;;  %1605 = vxpose.xlu1.c.b16.start.end [1/1] (short) %v1586_v33, 128  ;;  %5499 = vst [vmem:[#allocation16_spill] sm:$0xff] %v4036_v38 }
 0x1ef   : > { %v4064_v58 = vpop.trf.xlu1 }
 0x1f3   : > { %v4072_v62 = vpop.trf.xlu1 }
 0x1f4   : > { %5507 = vst [vmem:[#allocation24_spill] sm:$0xff] %v4072_v62 }
 0x1f7   : > { %v4086_v6 = vpop.trf.xlu1 }
 0x1f8   : > { %5509 = vst [vmem:[#allocation26_spill] sm:$0xff] %v4086_v6 }
 0x1fb   : > { %v4098_v19 = vpop.trf.xlu1 }
 0x1fc   : > { %5510 = vst [vmem:[#allocation27_spill] sm:$0xff] %v4098_v19 }
 0x1ff   : > { %v4104_v29 = vpop.trf.xlu1 }
 0x200   : > { %5511 = vst [vmem:[#allocation28_spill] sm:$0xff] %v4104_v29 }
 0x203   : > { %v4114_v33 = vpop.trf.xlu1 }
 0x204   : > { %5512 = vst [vmem:[#allocation29_spill] sm:$0xff] %v4114_v33 }
 0x20c   : > { %515 = vperm.xlu1 %3282, %v481_v34  }
 0x211   : > { %500 = vperm.xlu0 %3281, %v478_v35  }
 0x215   : > { %398 = vperm.xlu0 %3281, %v380_v36  }
 0x252   : > { %v4038_v39 = vpop.trf.xlu0 }
 0x253   : > { %5500 = vst [vmem:[#allocation17_spill] sm:$0xff] %v4038_v39 }
 0x256   : > { %v4040_v40 = vpop.trf.xlu0 }
 0x257   : > { %5501 = vst [vmem:[#allocation18_spill] sm:$0xff] %v4040_v40 }
 0x25a   : > { %v4042_v41 = vpop.trf.xlu0 }
 0x25b   : > { %5502 = vst [vmem:[#allocation19_spill] sm:$0xff] %v4042_v41 }
 0x25e   : > { %v4044_v43 = vpop.trf.xlu0 }
 0x25f   : > { %5503 = vst [vmem:[#allocation20_spill] sm:$0xff] %v4044_v43 }
 0x262   : > { %v4046_v44 = vpop.trf.xlu0 }
 0x263   : > { %5504 = vst [vmem:[#allocation21_spill] sm:$0xff] %v4046_v44 }
 0x266   : > { %v4050_v47 = vpop.trf.xlu0 }
 0x267   : > { %5505 = vst [vmem:[#allocation22_spill] sm:$0xff] %v4050_v47 }
 0x26a   : > { %v4062_v53 = vpop.trf.xlu0 }
 0x26b   : > { %5506 = vst [vmem:[#allocation23_spill] sm:$0xff] %v4062_v53 }
 0x26e   : > { %v4082_v3 = vpop.trf.xlu0 }
 0x26f   : > { %5508 = vst [vmem:[#allocation25_spill] sm:$0xff] %v4082_v3 }
 0x27f   : > { %v4052_v48 = vpop.f32.mrb[4].mxu0 }
 0x280   : > { %v4054_v49 = vpop.f32.mrb[5].mxu0 }
 0x281   : > { %v4058_v51 = vpop.f32.mrb[6].mxu0 }
 0x282   : > { %v4060_v52 = vpop.f32.mrb[7].mxu0 }
 0x287   : > { %v4066_v59 = vpop.f32.mrb[8].mxu0 }
 0x288   : > { %v881_v60 = vmax.f32 %v4052_v48, %v4066_v59  ;;  %v4070_v61 = vpop.f32.mrb[9].mxu0 }
 0x289   : > { %v879_v63 = vmax.f32 %v4054_v49, %v4070_v61  ;;  %v4076_v0 = vpop.f32.mrb[10].mxu0 }
 0x28a   : > { %v882_v1 = vmax.f32 %v4058_v51, %v4076_v0  ;;  %v4080_v2 = vpop.f32.mrb[11].mxu0 }
 0x28b   : > { %v880_v5 = vmax.f32 %v4060_v52, %v4080_v2 }
 0x28f   : > { %v4088_v7 = vpop.f32.mrb[12].mxu0 }
 0x290   : > { %v885_v9 = vmax.f32 %v881_v60, %v4088_v7  ;;  %v501_v4 = vpop.permute.xlu0 %500  ;;  %v4091_v11 = vpop.f32.mrb[13].mxu0 }
 0x291   : > { %v604_v13 = vadd.f32 %v3972_v54, %v501_v4  ;;  %v606_v14 = vadd.f32 %v3974_v55, %v501_v4  ;;  %v883_v16 = vmax.f32 %v879_v63, %v4091_v11  ;;  %v4096_v18 = vpop.f32.mrb[14].mxu0  ;;  %v613_v60 = vpop.f32.mrb[10].mxu1 }
 0x292   : > { %v886_v21 = vmax.f32 %v882_v1, %v4096_v18  ;;  %v4101_v23 = vpop.f32.mrb[15].mxu0  ;;  %v615_v63 = vpop.f32.mrb[11].mxu1 }
 0x293   : > { %v2062_v24 = vpack.c.bf16 %v604_v13, %v604_v13  ;;  %v2063_v26 = vpack.c.bf16 %v606_v14, %v606_v14  ;;  %v884_v28 = vmax.f32 %v880_v5, %v4101_v23  ;;  %v511_v1 = vpop.permute.xlu1 %510  ;;  %v4176_v19 = vpop.f32.mrb[12].mxu1 }
 0x294   : > { %v4120_v5 = vadd.f32 %v613_v60, %v511_v1 }
 0x295   : > { %2082 = vxpose.xlu0.c.b16.start.end [1/1] (short) %v2063_v26, 128  ;;  %2066 = vxpose.xlu1.c.b16.start.end [1/1] (short) %v2062_v24, 128 }
 0x296   : > { %5513 = vst [vmem:[#allocation30_spill] sm:$0xff] %v4120_v5  ;;  %v2546_v5 = vld [vmem:[%s5479_s5 + $0x10] sm:$0xff] }
 0x297   : > { %v4106_v54 = vpop.f32.mrb[16].mxu0 }
 0x298   : > { %v889_v55 = vmax.f32 %v885_v9, %v4106_v54  ;;  %v4109_v30 = vpop.f32.mrb[17].mxu0  ;;  %v616_v9 = vadd.f32 %v615_v63, %v511_v1 }
 0x299   : > { %v887_v31 = vmax.f32 %v883_v16, %v4109_v30  ;;  %v4112_v32 = vpop.f32.mrb[18].mxu0 }
 0x29a   : > { %v890_v34 = vmax.f32 %v886_v21, %v4112_v32  ;;  %v4117_v35 = vpop.f32.mrb[19].mxu0  ;;  %v1111_v16 = vpack.c.bf16 %v616_v9, %v616_v9 }
 0x29b   : > { %v888_v36 = vmax.f32 %v884_v28, %v4117_v35 }
 0x29c   : > { %1574 = vmatprep.mubr.bf16.mxu0 %v1111_v16 }
 0x29f   : > { %v4122_v4 = vpop.f32.mrb[20].mxu0 }
 0x2a0   : > { %v893_v13 = vmax.f32 %v889_v55, %v4122_v4  ;;  %v4125_v14 = vpop.f32.mrb[21].mxu0 }
 0x2a1   : > { %v891_v24 = vmax.f32 %v887_v31, %v4125_v14  ;;  %v4128_v21 = vpop.f32.mrb[22].mxu0 }
 0x2a2   : > { %v894_v26 = vmax.f32 %v890_v34, %v4128_v21  ;;  %v4131_v28 = vpop.f32.mrb[23].mxu0 }
 0x2a3   : > { %v892_v60 = vmax.f32 %v888_v36, %v4131_v28 }
 0x2a7   : > { %v4134_v42 = vpop.f32.mrb[24].mxu0 }
 0x2a8   : > { %v897_v63 = vmax.f32 %v893_v13, %v4134_v42  ;;  %v4137_v1 = vpop.f32.mrb[25].mxu0 }
 0x2a9   : > { %v895_v55 = vmax.f32 %v891_v24, %v4137_v1  ;;  %v4140_v9 = vpop.f32.mrb[26].mxu0 }
 0x2aa   : > { %v898_v31 = vmax.f32 %v894_v26, %v4140_v9  ;;  %v4143_v3 = vpop.f32.mrb[27].mxu0 }
 0x2ab   : > { %v896_v34 = vmax.f32 %v892_v60, %v4143_v3  ;;  %v482_v60 = vld [vmem:[%s5477_s3 + $0x58] sm:$0xff] }
 0x2af   : > { %v4146_v53 = vpop.f32.mrb[28].mxu0 }
 0x2b0   : > { %v901_v36 = vmax.f32 %v897_v63, %v4146_v53  ;;  %v4149_v16 = vpop.f32.mrb[29].mxu0 }
 0x2b1   : > { %v899_v13 = vmax.f32 %v895_v55, %v4149_v16  ;;  %v4152_v47 = vpop.f32.mrb[30].mxu0 }
 0x2b2   : > { %v902_v24 = vmax.f32 %v898_v31, %v4152_v47  ;;  %v4155_v44 = vpop.f32.mrb[31].mxu0 }
 0x2b3   : > { %v900_v26 = vmax.f32 %v896_v34, %v4155_v44 }
 0x2b7   : > { %v4158_v43 = vpop.f32.mrb[32].mxu0 }
 0x2b8   : > { %v905_v63 = vmax.f32 %v901_v36, %v4158_v43  ;;  %v4164_v41 = vpop.f32.mrb[33].mxu0 }
 0x2b9   : > { %v903_v55 = vmax.f32 %v899_v13, %v4164_v41  ;;  %v4167_v40 = vpop.f32.mrb[34].mxu0 }
 0x2ba   : > { %v906_v31 = vmax.f32 %v902_v24, %v4167_v40  ;;  %520 = vperm.xlu0 %3281, %v482_v60   ;;  %v4170_v39 = vpop.f32.mrb[35].mxu0 }
 0x2bb   : > { %v904_v34 = vmax.f32 %v900_v26, %v4170_v39 }
 0x2bc   : > { %v908_v37 = vmax.f32 %v905_v63, %v906_v31 }
 0x2bd   : > { %v907_v38 = vmax.f32 %v903_v55, %v904_v34 }
 0x2be   : > { %2560 = vperm.xlu0 %3281, %v2546_v5  }
 0x2bf   : > { %v909_v36 = vmax.f32 %v907_v38, %v908_v37  ;;  %v4188_v38 = vpop.f32.mrb[13].mxu1 }
 0x2c1   : > { %v910_v33 = vrot.slane %v909_v36, 4 }
 0x2c3   : > { %v911_v29 = vmax.f32 %v909_v36, %v910_v33  ;;  %v4198_v33 = vpop.f32.mrb[14].mxu1 }
 0x2c4   : > { %v4208_v5 = vpop.f32.mrb[15].mxu1 }
 0x2c5   : > { %v912_v13 = vrot.slane %v911_v29, 2 }
 0x2c7   : > { %v913_v6 = vmax.f32 %v911_v29, %v912_v13 }
 0x2c9   : > { %v914_v24 = vrot.slane %v913_v6, 1 }
 0x2cb   : > { %v4178_v60 = vmax.f32 %v913_v6, %v914_v24 }
 0x2cd   : > { %v916_v26 = vsub.f32 %v4054_v49, %v4178_v60  ;;  %v917_v62 = vsub.f32 %v4060_v52, %v4178_v60  ;;  %v918_v63 = vsub.f32 %v4052_v48, %v4178_v60  ;;  %v919_v37 = vsub.f32 %v4058_v51, %v4178_v60 }
 0x2ce   : > { %v920_v29 = vsub.f32 %v4070_v61, %v4178_v60  ;;  %v921_v6 = vsub.f32 %v4080_v2, %v4178_v60  ;;  %v922_v49 = vsub.f32 %v4066_v59, %v4178_v60  ;;  %v923_v52 = vsub.f32 %v4076_v0, %v4178_v60 }
 0x2cf   : > { %v924_v48 = vsub.f32 %v4091_v11, %v4178_v60  ;;  %v925_v51 = vsub.f32 %v4101_v23, %v4178_v60  ;;  %v926_v61 = vsub.f32 %v4088_v7, %v4178_v60  ;;  %v927_v2 = vsub.f32 %v4096_v18, %v4178_v60 }
 0x2d0   : > { %v928_v59 = vsub.f32 %v4109_v30, %v4178_v60  ;;  %v929_v0 = vsub.f32 %v4117_v35, %v4178_v60  ;;  %v930_v11 = vsub.f32 %v4106_v54, %v4178_v60  ;;  %v931_v23 = vsub.f32 %v4112_v32, %v4178_v60 }
 0x2d1   : > { %v932_v7 = vsub.f32 %v4125_v14, %v4178_v60  ;;  %v933_v18 = vsub.f32 %v4131_v28, %v4178_v60  ;;  %v934_v55 = vsub.f32 %v4122_v4, %v4178_v60  ;;  %v935_v30 = vsub.f32 %v4128_v21, %v4178_v60 }
 0x2d2   : > { %v948_v28 = vmul.f32 1.442695, %v916_v26  ;;  %v950_v4 = vmul.f32 1.442695, %v917_v62  ;;  %v952_v14 = vmul.f32 1.442695, %v918_v63 }
 0x2d3   : > { %v954_v32 = vmul.f32 1.442695, %v919_v37  ;;  %v956_v21 = vmul.f32 1.442695, %v920_v29  ;;  %v958_v31 = vmul.f32 1.442695, %v921_v6 }
 0x2d4   : > { %3291 = vpow2.f32 %v948_v28  ;;  %v960_v54 = vmul.f32 1.442695, %v922_v49  ;;  %v962_v34 = vmul.f32 1.442695, %v923_v52  ;;  %v964_v36 = vmul.f32 1.442695, %v924_v48 }
 0x2d5   : > { %3293 = vpow2.f32 %v950_v4  ;;  %v966_v35 = vmul.f32 1.442695, %v925_v51  ;;  %v968_v13 = vmul.f32 1.442695, %v926_v61  ;;  %v970_v24 = vmul.f32 1.442695, %v927_v2 }
 0x2d6   : > { %3295 = vpow2.f32 %v952_v14  ;;  %v972_v62 = vmul.f32 1.442695, %v928_v59  ;;  %v2544_v26 = vld [vmem:[%s5479_s5] sm:$0xff]  ;;  %v974_v63 = vmul.f32 1.442695, %v929_v0  ;;  %v2545_v6 = vld [vmem:[%s5479_s5 + $0x8] sm:$0xff] }
 0x2d7   : > { %3297 = vpow2.f32 %v954_v32  ;;  %2550 = vperm.xlu1 %3282, %v2544_v26   ;;  %v976_v29 = vmul.f32 1.442695, %v930_v11  ;;  %v978_v52 = vmul.f32 1.442695, %v931_v23  ;;  %v980_v51 = vmul.f32 1.442695, %v932_v7 }
 0x2d8   : > { %3299 = vpow2.f32 %v956_v21  ;;  %v982_v0 = vmul.f32 1.442695, %v933_v18  ;;  %v986_v32 = vmul.f32 1.442695, %v935_v30  ;;  %v5514_v18 = vsub.f32 %v4137_v1, %v4178_v60 }
 0x2d9   : > { %3301 = vpow2.f32 %v958_v31  ;;  %v5515_v31 = vsub.f32 %v4143_v3, %v4178_v60  ;;  %v5517_v26 = vsub.f32 %v4140_v9, %v4178_v60 }
 0x2da   : > { %3303 = vpow2.f32 %v960_v54  ;;  %v988_v28 = vmul.f32 1.442695, %v5514_v18 }
 0x2db   : > { %3305 = vpow2.f32 %v962_v34  ;;  %2555 = vperm.xlu1 %3282, %v2545_v6   ;;  %v990_v34 = vmul.f32 1.442695, %v5515_v31  ;;  %v994_v3 = vmul.f32 1.442695, %v5517_v26  ;;  %v5522_v31 = vsub.f32 %v4164_v41, %v4178_v60 }
 0x2dc   : > { %3307 = vpow2.f32 %v964_v36  ;;  %v5516_v36 = vsub.f32 %v4134_v42, %v4178_v60 }
 0x2dd   : > { %3309 = vpow2.f32 %v966_v35  ;;  %v984_v35 = vmul.f32 1.442695, %v934_v55 }
 0x2de   : > { %v4253_v37 = vpop.eup %3291  ;;  %3311 = vpow2.f32 %v968_v13  ;;  %v992_v1 = vmul.f32 1.442695, %v5516_v36 }
 0x2df   : > { %v4258_v49 = vpop.eup %3293  ;;  %3313 = vpow2.f32 %v970_v24 }
 0x2e0   : > { %v4260_v48 = vpop.eup %3295  ;;  %3315 = vpow2.f32 %v972_v62  ;;  %v1012_v61 = vadd.f32 %v4258_v49, %v4253_v37  ;;  %v1049_v2 = vpack.c.bf16 %v4258_v49, %v4253_v37 }
 0x2e1   : > { %v4266_v59 = vpop.eup %3297  ;;  %3317 = vpow2.f32 %v974_v63 }
 0x2e2   : > { %v4268_v11 = vpop.eup %3299  ;;  %3319 = vpow2.f32 %v976_v29  ;;  %v1013_v23 = vadd.f32 %v4260_v48, %v1012_v61  ;;  %v1050_v7 = vpack.c.bf16 %v4266_v59, %v4260_v48  ;;  %v5518_v29 = vsub.f32 %v4149_v16, %v4178_v60 }
 0x2e3   : > { %v4273_v54 = vpop.eup %3301  ;;  %3321 = vpow2.f32 %v978_v52  ;;  %v5519_v61 = vsub.f32 %v4155_v44, %v4178_v60 }
 0x2e4   : > { %v4275_v14 = vpop.eup %3303  ;;  %3323 = vpow2.f32 %v980_v51  ;;  %v1014_v4 = vadd.f32 %v4266_v59, %v1013_v23  ;;  %v1051_v55 = vpack.c.bf16 %v4273_v54, %v4268_v11  ;;  %v996_v42 = vmul.f32 1.442695, %v5518_v29 }
 0x2e5   : > { %v4283_v21 = vpop.eup %3305  ;;  %3325 = vpow2.f32 %v982_v0  ;;  %v998_v9 = vmul.f32 1.442695, %v5519_v61  ;;  %v5525_v61 = vsub.f32 %v4167_v40, %v4178_v60 }
 0x2e6   : > { %v4288_v30 = vpop.eup %3307  ;;  %3327 = vpow2.f32 %v984_v35  ;;  %v1015_v13 = vadd.f32 %v4268_v11, %v1014_v4  ;;  %v1052_v24 = vpack.c.bf16 %v4283_v21, %v4275_v14  ;;  %v5520_v35 = vsub.f32 %v4146_v53, %v4178_v60 }
 0x2e7   : > { %v4296_v62 = vpop.eup %3309  ;;  %3329 = vpow2.f32 %v986_v32  ;;  %v1004_v53 = vmul.f32 1.442695, %v5522_v31 }
 0x2e8   : > { %v4301_v63 = vpop.eup %3311  ;;  %3331 = vpow2.f32 %v988_v28  ;;  %v1016_v6 = vadd.f32 %v4273_v54, %v1015_v13  ;;  %v1053_v52 = vpack.c.bf16 %v4296_v62, %v4288_v30  ;;  %v1000_v16 = vmul.f32 1.442695, %v5520_v35 }
 0x2e9   : > { %v4309_v51 = vpop.eup %3313  ;;  %3333 = vpow2.f32 %v990_v34  ;;  %v5521_v28 = vsub.f32 %v4152_v47, %v4178_v60  ;;  %v5523_v13 = vsub.f32 %v4170_v39, %v4178_v60 }
 0x2ea   : > { %v4314_v0 = vpop.eup %3315  ;;  %3335 = vpow2.f32 %v992_v1  ;;  %v1017_v23 = vadd.f32 %v4275_v14, %v1016_v6  ;;  %v1054_v32 = vpack.c.bf16 %v4309_v51, %v4301_v63 }
 0x2eb   : > { %v4322_v18 = vpop.eup %3317  ;;  %3337 = vpow2.f32 %v994_v3  ;;  %v1002_v44 = vmul.f32 1.442695, %v5521_v28  ;;  %v1006_v47 = vmul.f32 1.442695, %v5523_v13  ;;  %v5524_v3 = vsub.f32 %v4158_v43, %v4178_v60 }
 0x2ec   : > { %v4327_v4 = vpop.eup %3319  ;;  %3339 = vpow2.f32 %v996_v42  ;;  %v1018_v34 = vadd.f32 %v4283_v21, %v1017_v23  ;;  %v1055_v36 = vpack.c.bf16 %v4322_v18, %v4314_v0  ;;  %v456_v21 = vadd.f32 %v3964_v45, %v3994_v8 }
 0x2ed   : > { %v4335_v1 = vpop.eup %3321  ;;  %3341 = vpow2.f32 %v998_v9  ;;  %v1008_v29 = vmul.f32 1.442695, %v5524_v3  ;;  %v1010_v9 = vmul.f32 1.442695, %v5525_v61 }
 0x2ee   : > { %v3324_v26 = vpop.eup %3323  ;;  %3343 = vpow2.f32 %v1000_v16  ;;  %v1019_v41 = vadd.f32 %v4288_v30, %v1018_v34  ;;  %v1056_v42 = vpack.c.bf16 %v4335_v1, %v4327_v4  ;;  %v610_v30 = vadd.f32 %v3976_v56, %v3978_v57 }
 0x2ef   : > { %v3326_v6 = vpop.eup %3325  ;;  %3345 = vpow2.f32 %v1002_v44 }
 0x2f0   : > { %v3328_v35 = vpop.eup %3327  ;;  %3347 = vpow2.f32 %v1004_v53  ;;  %v1020_v39 = vadd.f32 %v4296_v62, %v1019_v41  ;;  %v1057_v16 = vpack.c.bf16 %v3326_v6, %v3324_v26 }
 0x2f1   : > { %v3330_v23 = vpop.eup %3329  ;;  %3349 = vpow2.f32 %v1006_v47 }
 0x2f2   : > { %v3332_v43 = vpop.eup %3331  ;;  %3351 = vpow2.f32 %v1008_v29  ;;  %v1021_v28 = vadd.f32 %v4301_v63, %v1020_v39  ;;  %2879 = vmatprep.subr.bf16.mxu1 %v1057_v16  ;;  %v1058_v31 = vpack.c.bf16 %v3330_v23, %v3328_v35 }
 0x2f3   : > { %v3334_v34 = vpop.eup %3333  ;;  %3353 = vpow2.f32 %v1010_v9  ;;  %2880 = vmatpush3.bf16.msra.mxu1 %v1049_v2 }
 0x2f4   : > { %v3336_v40 = vpop.eup %3335  ;;  %v1022_v60 = vadd.f32 %v4309_v51, %v1021_v28  ;;  %2881 = vmatprep.subr.bf16.mxu1 %v1058_v31  ;;  %v1059_v44 = vpack.c.bf16 %v3334_v34, %v3332_v43  ;;  %v631_v51 = vpack.c.bf16 %v610_v30, %v610_v30 }
 0x2f5   : > { %v3338_v53 = vpop.eup %3337 }
 0x2f6   : > { %v3340_v13 = vpop.eup %3339  ;;  %v1023_v47 = vadd.f32 %v4314_v0, %v1022_v60  ;;  %v1060_v3 = vpack.c.bf16 %v3338_v53, %v3336_v40 }
 0x2f7   : > { %v3342_v29 = vpop.eup %3341  ;;  %2882 = vmatpush3.bf16.msra.mxu1 %v1050_v7 }
 0x2f8   : > { %v3344_v41 = vpop.eup %3343  ;;  %v1024_v61 = vadd.f32 %v4322_v18, %v1023_v47  ;;  %2883 = vmatprep.subr.bf16.mxu1 %v1059_v44  ;;  %v1061_v37 = vpack.c.bf16 %v3342_v29, %v3340_v13  ;;  %v4368_v47 = vpop.permute.xlu0 %398 }
 0x2f9   : > { %v3346_v49 = vpop.eup %3345 }
 0x2fa   : > { %v3348_v2 = vpop.eup %3347  ;;  %v1025_v9 = vadd.f32 %v4327_v4, %v1024_v61  ;;  %v1062_v39 = vpack.c.bf16 %v3346_v49, %v3344_v41  ;;  %v4398_v4 = vpop.trf.xlu1 }
 0x2fb   : > { %v3350_v16 = vpop.eup %3349  ;;  %2884 = vmatpush3.bf16.msra.mxu1 %v1051_v55 }
 0x2fc   : > { %v3352_v28 = vpop.eup %3351  ;;  %v1026_v31 = vadd.f32 %v4335_v1, %v1025_v9  ;;  %2885 = vmatprep.subr.bf16.mxu1 %v1060_v3  ;;  %v1063_v48 = vpack.c.bf16 %v3350_v16, %v3348_v2  ;;  %v4373_v55 = vpop.trf.xlu0  ;;  %v5538_v3 = vld [vmem:[#allocation29_spill] sm:$0xff] }
 0x2fd   : > { %v3354_v59 = vpop.eup %3353 }
 0x2fe   : > { %v1027_v7 = vadd.f32 %v3324_v26, %v1026_v31  ;;  %v1064_v60 = vpack.c.bf16 %v3354_v59, %v3352_v28  ;;  %v1107_v26 = vpack.c.bf16 %v456_v21, %v456_v21 }
 0x2ff   : > { %2886 = vmatpush3.bf16.msra.mxu1 %v1052_v24 }
 0x300   : > { %v1028_v44 = vadd.f32 %v3326_v6, %v1027_v7  ;;  %2887 = vmatprep.subr.bf16.mxu1 %v1061_v37  ;;  %v1193_v8 = vsel %vm714_vm1, %v1107_v26, 0 }
 0x302   : > { %v1029_v61 = vadd.f32 %v3328_v35, %v1028_v44  ;;  %v4406_v35 = vpop.trf.xlu1 }
 0x303   : > { %2888 = vmatpush3.bf16.msra.mxu1 %v1053_v52  ;;  %v4385_v52 = vpop.trf.xlu0 }
 0x304   : > { %v1030_v11 = vadd.f32 %v3330_v23, %v1029_v61  ;;  %2889 = vmatprep.subr.bf16.mxu1 %v1062_v39  ;;  %5526 = vst [vmem:[#allocation31_spill] sm:$0xff] %v4385_v52 }
 0x306   : > { %v1031_v54 = vadd.f32 %v3332_v43, %v1030_v11  ;;  %v4414_v23 = vpop.trf.xlu1 }
 0x307   : > { %2890 = vmatpush3.bf16.msra.mxu1 %v1054_v32  ;;  %v4392_v32 = vpop.trf.xlu0 }
 0x308   : > { %v1032_v14 = vadd.f32 %v3334_v34, %v1031_v54  ;;  %2891 = vmatprep.subr.bf16.mxu1 %v1063_v48  ;;  %5527 = vst [vmem:[#allocation32_spill] sm:$0xff] %v4392_v32 }
 0x30a   : > { %v1033_v24 = vadd.f32 %v3336_v40, %v1032_v14  ;;  %v5535_v40 = vld [vmem:[#allocation26_spill] sm:$0xff] }
 0x30b   : > { %2892 = vmatpush3.bf16.msra.mxu1 %v1055_v36  ;;  %v4396_v36 = vpop.trf.xlu0 }
 0x30c   : > { %v1034_v62 = vadd.f32 %v3338_v53, %v1033_v24  ;;  %2893 = vmatprep.subr.bf16.mxu1 %v1064_v60  ;;  %5528 = vst [vmem:[#allocation33_spill] sm:$0xff] %v4396_v36 }
 0x30e   : > { %v1035_v63 = vadd.f32 %v3340_v13, %v1034_v62  ;;  %v5537_v13 = vld [vmem:[#allocation28_spill] sm:$0xff] }
 0x30f   : > { %2894 = vmatpush3.bf16.msra.mxu1 %v1056_v42  ;;  %v4404_v6 = vpop.trf.xlu0 }
 0x310   : > { %v1036_v45 = vadd.f32 %v3342_v29, %v1035_v63  ;;  %3175 = vmatprep.subr.msk.bf16.mxu1 %vm714_vm1, %v1107_v26  ;;  %5529 = vst [vmem:[#allocation34_spill] sm:$0xff] %v4404_v6  ;;  %v2547_v29 = vld [vmem:[%s5479_s5 + $0x18] sm:$0xff] }
 0x311   : > { %2565 = vperm.xlu1 %3282, %v2547_v29  }
 0x312   : > { %v1037_v0 = vadd.f32 %v3344_v41, %v1036_v45  ;;  %1098 = vmatmul.mubr.bf16.vlgmr.msra.gmra.mrb[16].mxu1 %v631_v51 }
 0x313   : > { %3065 = vmatpush3.bf16.msra.mxu1 %v1193_v8  ;;  %3066 = vmatprep.mubr.msk.bf16.mxu1 %vm665_vm2, %v3997_v10  ;;  %v4412_v10 = vpop.trf.xlu0 }
 0x314   : > { %v1038_v56 = vadd.f32 %v3346_v49, %v1037_v0  ;;  %5530 = vst [vmem:[#allocation35_spill] sm:$0xff] %v4412_v10 }
 0x316   : > { %v1039_v57 = vadd.f32 %v3348_v2, %v1038_v56 }
 0x318   : > { %v1040_v18 = vadd.f32 %v3350_v16, %v1039_v57 }
 0x31a   : > { %v1041_v1 = vadd.f32 %v3352_v28, %v1040_v18  ;;  %3067 = vmatmul.mubr.msk.bf16.vlgmr.msra.gmra.mrb[20].mxu1 %vm665_vm2, %v4001_v12  ;;  %v4418_v12 = vpop.trf.xlu0 }
 0x31b   : > { %3070 = vmatprep.mubr.msk.bf16.mxu1 %vm665_vm2, %v4004_v15  ;;  %5531 = vst [vmem:[#allocation36_spill] sm:$0xff] %v4418_v12  ;;  %v4420_v15 = vpop.trf.xlu1 }
 0x31c   : > { %v1042_v42 = vadd.f32 %v3354_v59, %v1041_v1 }
 0x31e   : > { %v4424_v43 = vpop.trf.xlu0  ;;  %v1043_v41 = vrot.slane %v1042_v42, 4 }
 0x31f   : > { %5532 = vst [vmem:[#allocation37_spill] sm:$0xff] %v4424_v43 }
 0x320   : > { %v1044_v37 = vadd.f32 %v1043_v41, %v1042_v42 }
 0x322   : > { %3071 = vmatmul.mubr.msk.bf16.gmra.mrb[24].mxu1 %vm665_vm2, %v4008_v17  ;;  %v4426_v17 = vpop.trf.xlu1  ;;  %v1045_v49 = vrot.slane %v1044_v37, 2 }
 0x323   : > { %3074 = vmatprep.mubr.msk.bf16.mxu1 %vm665_vm2, %v4011_v20 }
 0x324   : > { %v1046_v2 = vadd.f32 %v1045_v49, %v1044_v37 }
 0x326   : > { %v1047_v9 = vrot.slane %v1046_v2, 1 }
 0x328   : > { %v1048_v39 = vadd.f32 %v1047_v9, %v1046_v2 }
 0x32a   : > { %3075 = vmatmul.mubr.msk.bf16.gmra.mrb[28].mxu1 %vm665_vm2, %v4015_v22  ;;  %v4434_v22 = vpop.trf.xlu1  ;;  %3355 = vrcp.f32 %v1048_v39 }
 0x32b   : > { %3078 = vmatprep.mubr.msk.bf16.mxu1 %vm665_vm2, %v4018_v25 }
 0x32e   : > { %v4444_v25 = vpop.trf.xlu1 }
 0x332   : > { %3079 = vmatmul.mubr.msk.bf16.gmra.mrb[32].mxu1 %vm665_vm2, %v4022_v27  ;;  %v5534_v27 = vld [vmem:[#allocation24_spill] sm:$0xff] }
 0x333   : > { %3082 = vmatprep.mubr.msk.bf16.mxu1 %vm665_vm2, %v4048_v46  ;;  %v4448_v46 = vpop.trf.xlu1 }
 0x334   : > { %v3356_v48 = vpop.eup %3355 }
 0x337   : > { %v4452_v53 = vpop.permute.xlu1 %515 }
 0x339   : > { %v4432_v20 = vpop.permute.xlu0 %520 }
 0x33a   : > { %v4438_v34 = vadd.f32 %v4198_v33, %v4432_v20  ;;  %3083 = vmatmul.mubr.msk.bf16.gmra.mrb[36].mxu1 %vm665_vm2, %v4056_v50  ;;  %v5536_v33 = vld [vmem:[#allocation27_spill] sm:$0xff]  ;;  %v622_v50 = vadd.f32 %v4188_v38, %v4452_v53 }
 0x33b   : > { %3086 = vmatprep.mubr.msk.bf16.mxu1 %vm665_vm2, %v4064_v58 }
 0x33c   : > { %5533 = vst [vmem:[#allocation38_spill] sm:$0xff] %v4438_v34  ;;  %v1588_v58 = vpack.c.bf16 %v622_v50, %v622_v50 }
 0x342   : > { %3087 = vmatmul.mubr.msk.bf16.gmra.mrb[40].mxu1 %vm665_vm2, %v5534_v27 }
 0x343   : > { %3090 = vmatprep.mubr.msk.bf16.mxu1 %vm665_vm2, %v5535_v40 }
 0x34a   : > { %3091 = vmatmul.mubr.msk.bf16.gmra.mrb[44].mxu1 %vm665_vm2, %v5536_v33 }
 0x34b   : > { %3094 = vmatprep.mubr.msk.bf16.mxu1 %vm665_vm2, %v5537_v13 }
 0x352   : > { %3095 = vmatmul.mubr.msk.bf16.gmra.mrb[48].mxu1 %vm665_vm2, %v5538_v3 }
 0x353   : > { %2051 = vmatprep.mubr.bf16.mxu1 %v1588_v58 }
 0x3e5   : > { %v2895_v16 = vpop.f32.mrb[16].mxu1 }
 0x3e6   : > { %v2896_v28 = vpop.f32.mrb[17].mxu1 }
 0x3e7   : > { %v2897_v38 = vadd.f32 %v2896_v28, %v2895_v16  ;;  %v2898_v31 = vpop.f32.mrb[18].mxu1 }
 0x3e8   : > { %v2899_v59 = vpop.f32.mrb[19].mxu1 }
 0x3e9   : > { %v4465_v7 = vmul.f32 %v3356_v48, %v2897_v38 }
 0x3ed   : > { %v4467_v60 = vpop.f32.mrb[20].mxu1 }
 0x3ee   : > { %v4469_v44 = vpop.f32.mrb[21].mxu1 }
 0x3ef   : > { %v4471_v61 = vpop.f32.mrb[22].mxu1 }
 0x3f0   : > { %v4473_v11 = vpop.f32.mrb[23].mxu1 }
 0x3f5   : > { %v4475_v54 = vpop.f32.mrb[24].mxu1 }
 0x3f6   : > { %v1358_v14 = vmax.f32 %v4467_v60, %v4475_v54  ;;  %v4479_v21 = vpop.f32.mrb[25].mxu1 }
 0x3f7   : > { %v1356_v24 = vmax.f32 %v4469_v44, %v4479_v21  ;;  %v4483_v30 = vpop.f32.mrb[26].mxu1 }
 0x3f8   : > { %v1359_v62 = vmax.f32 %v4471_v61, %v4483_v30  ;;  %v4487_v26 = vpop.f32.mrb[27].mxu1 }
 0x3f9   : > { %v1357_v63 = vmax.f32 %v4473_v11, %v4487_v26 }
 0x3fd   : > { %v4491_v51 = vpop.f32.mrb[28].mxu1 }
 0x3fe   : > { %v1362_v45 = vmax.f32 %v1358_v14, %v4491_v51  ;;  %v4494_v8 = vpop.f32.mrb[29].mxu1 }
 0x3ff   : > { %v1360_v0 = vmax.f32 %v1356_v24, %v4494_v8  ;;  %v4497_v56 = vpop.f32.mrb[30].mxu1 }
 0x400   : > { %v1363_v57 = vmax.f32 %v1359_v62, %v4497_v56  ;;  %v4500_v18 = vpop.f32.mrb[31].mxu1 }
 0x401   : > { %v1361_v1 = vmax.f32 %v1357_v63, %v4500_v18 }
 0x405   : > { %v4503_v42 = vpop.f32.mrb[32].mxu1 }
 0x406   : > { %v1366_v27 = vmax.f32 %v1362_v45, %v4503_v42  ;;  %v4506_v40 = vpop.f32.mrb[33].mxu1 }
 0x407   : > { %v1364_v33 = vmax.f32 %v1360_v0, %v4506_v40  ;;  %v4509_v13 = vpop.f32.mrb[34].mxu1 }
 0x408   : > { %v1367_v50 = vmax.f32 %v1363_v57, %v4509_v13  ;;  %v4512_v58 = vpop.f32.mrb[35].mxu1 }
 0x409   : > { %v1365_v3 = vmax.f32 %v1361_v1, %v4512_v58 }
 0x40d   : > { %v4515_v29 = vpop.f32.mrb[36].mxu1 }
 0x40e   : > { %v1370_v41 = vmax.f32 %v1366_v27, %v4515_v29  ;;  %v4518_v37 = vpop.f32.mrb[37].mxu1 }
 0x40f   : > { %v1368_v49 = vmax.f32 %v1364_v33, %v4518_v37  ;;  %v4521_v2 = vpop.f32.mrb[38].mxu1 }
 0x410   : > { %v1371_v9 = vmax.f32 %v1367_v50, %v4521_v2  ;;  %v4524_v39 = vpop.f32.mrb[39].mxu1 }
 0x411   : > { %v1369_v16 = vmax.f32 %v1365_v3, %v4524_v39 }
 0x415   : > { %v4527_v28 = vpop.f32.mrb[40].mxu1 }
 0x416   : > { %v1374_v38 = vmax.f32 %v1370_v41, %v4527_v28  ;;  %v4530_v31 = vpop.f32.mrb[41].mxu1 }
 0x417   : > { %v1372_v48 = vmax.f32 %v1368_v49, %v4530_v31  ;;  %v4533_v59 = vpop.f32.mrb[42].mxu1 }
 0x418   : > { %v1375_v14 = vmax.f32 %v1371_v9, %v4533_v59  ;;  %v4536_v24 = vpop.f32.mrb[43].mxu1 }
 0x419   : > { %v1373_v62 = vmax.f32 %v1369_v16, %v4536_v24 }
 0x41d   : > { %v4539_v63 = vpop.f32.mrb[44].mxu1 }
 0x41e   : > { %v1378_v45 = vmax.f32 %v1374_v38, %v4539_v63  ;;  %v4542_v0 = vpop.f32.mrb[45].mxu1 }
 0x41f   : > { %v1376_v57 = vmax.f32 %v1372_v48, %v4542_v0  ;;  %v4545_v1 = vpop.f32.mrb[46].mxu1 }
 0x420   : > { %v1379_v27 = vmax.f32 %v1375_v14, %v4545_v1  ;;  %v4548_v33 = vpop.f32.mrb[47].mxu1 }
 0x421   : > { %v1377_v50 = vmax.f32 %v1373_v62, %v4548_v33 }
 0x425   : > { %v4551_v3 = vpop.f32.mrb[48].mxu1 }
 0x426   : > { %v1382_v41 = vmax.f32 %v1378_v45, %v4551_v3  ;;  %v4554_v49 = vpop.f32.mrb[49].mxu1 }
 0x427   : > { %v1380_v9 = vmax.f32 %v1376_v57, %v4554_v49  ;;  %v4557_v16 = vpop.f32.mrb[50].mxu1 }
 0x428   : > { %v1383_v38 = vmax.f32 %v1379_v27, %v4557_v16  ;;  %v4560_v48 = vpop.f32.mrb[51].mxu1 }
 0x429   : > { %v1381_v14 = vmax.f32 %v1377_v50, %v4560_v48 }
 0x42a   : > { %v1385_v34 = vmax.f32 %v1382_v41, %v1383_v38 }
 0x42b   : > { %v1384_v43 = vmax.f32 %v1380_v9, %v1381_v14 }
 0x42d   : > { %v1386_v12 = vmax.f32 %v1384_v43, %v1385_v34 }
 0x42f   : > { %v1387_v62 = vrot.slane %v1386_v12, 4 }
 0x431   : > { %v1388_v10 = vmax.f32 %v1386_v12, %v1387_v62 }
 0x433   : > { %v1389_v6 = vrot.slane %v1388_v10, 2 }
 0x435   : > { %v1390_v36 = vmax.f32 %v1388_v10, %v1389_v6 }
 0x437   : > { %v1391_v45 = vrot.slane %v1390_v36, 1 }
 0x439   : > { %v4563_v32 = vmax.f32 %v1390_v36, %v1391_v45 }
 0x43b   : > { %v1393_v57 = vsub.f32 %v4469_v44, %v4563_v32  ;;  %v1394_v27 = vsub.f32 %v4473_v11, %v4563_v32  ;;  %v1395_v52 = vsub.f32 %v4467_v60, %v4563_v32  ;;  %v1396_v50 = vsub.f32 %v4471_v61, %v4563_v32 }
 0x43c   : > { %v1397_v12 = vsub.f32 %v4479_v21, %v4563_v32  ;;  %v1398_v6 = vsub.f32 %v4487_v26, %v4563_v32  ;;  %v1399_v36 = vsub.f32 %v4475_v54, %v4563_v32  ;;  %v1400_v10 = vsub.f32 %v4483_v30, %v4563_v32 }
 0x43d   : > { %v1401_v43 = vsub.f32 %v4494_v8, %v4563_v32  ;;  %v1402_v34 = vsub.f32 %v4500_v18, %v4563_v32  ;;  %v1403_v60 = vsub.f32 %v4491_v51, %v4563_v32  ;;  %v1404_v44 = vsub.f32 %v4497_v56, %v4563_v32 }
 0x43e   : > { %v1405_v61 = vsub.f32 %v4506_v40, %v4563_v32  ;;  %v1406_v11 = vsub.f32 %v4512_v58, %v4563_v32  ;;  %v1407_v54 = vsub.f32 %v4503_v42, %v4563_v32  ;;  %v1408_v21 = vsub.f32 %v4509_v13, %v4563_v32 }
 0x43f   : > { %v1409_v30 = vsub.f32 %v4518_v37, %v4563_v32  ;;  %v1410_v26 = vsub.f32 %v4524_v39, %v4563_v32  ;;  %v1411_v51 = vsub.f32 %v4515_v29, %v4563_v32  ;;  %v1412_v8 = vsub.f32 %v4521_v2, %v4563_v32 }
 0x440   : > { %v1413_v56 = vsub.f32 %v4530_v31, %v4563_v32  ;;  %v1414_v18 = vsub.f32 %v4536_v24, %v4563_v32  ;;  %v1415_v42 = vsub.f32 %v4527_v28, %v4563_v32  ;;  %v1416_v40 = vsub.f32 %v4533_v59, %v4563_v32 }
 0x441   : > { %v1417_v13 = vsub.f32 %v4542_v0, %v4563_v32  ;;  %v1425_v9 = vmul.f32 1.442695, %v1393_v57  ;;  %v1427_v38 = vmul.f32 1.442695, %v1394_v27  ;;  %v1429_v14 = vmul.f32 1.442695, %v1395_v52 }
 0x442   : > { %v1431_v62 = vmul.f32 1.442695, %v1396_v50  ;;  %v1433_v45 = vmul.f32 1.442695, %v1397_v12  ;;  %v1435_v37 = vmul.f32 1.442695, %v1398_v6 }
 0x443   : > { %3357 = vpow2.f32 %v1425_v9  ;;  %v1437_v29 = vmul.f32 1.442695, %v1399_v36  ;;  %v1439_v2 = vmul.f32 1.442695, %v1400_v10  ;;  %v1441_v39 = vmul.f32 1.442695, %v1401_v43 }
 0x444   : > { %3359 = vpow2.f32 %v1427_v38  ;;  %v1443_v58 = vmul.f32 1.442695, %v1402_v34  ;;  %v1445_v31 = vmul.f32 1.442695, %v1403_v60  ;;  %v1447_v41 = vmul.f32 1.442695, %v1404_v44 }
 0x445   : > { %3361 = vpow2.f32 %v1429_v14  ;;  %v1449_v57 = vmul.f32 1.442695, %v1405_v61  ;;  %v1451_v52 = vmul.f32 1.442695, %v1406_v11  ;;  %v1453_v50 = vmul.f32 1.442695, %v1407_v54 }
 0x446   : > { %3363 = vpow2.f32 %v1431_v62  ;;  %v1455_v6 = vmul.f32 1.442695, %v1408_v21  ;;  %v1457_v10 = vmul.f32 1.442695, %v1409_v30  ;;  %v1459_v44 = vmul.f32 1.442695, %v1410_v26 }
 0x447   : > { %3365 = vpow2.f32 %v1433_v45  ;;  %v1461_v11 = vmul.f32 1.442695, %v1411_v51  ;;  %v1467_v51 = vmul.f32 1.442695, %v1414_v18  ;;  %v1471_v24 = vmul.f32 1.442695, %v1416_v40 }
 0x448   : > { %3367 = vpow2.f32 %v1435_v37  ;;  %v1465_v37 = vmul.f32 1.442695, %v1413_v56  ;;  %v1473_v28 = vmul.f32 1.442695, %v1417_v13  ;;  %v5539_v62 = vsub.f32 %v4548_v33, %v4563_v32 }
 0x449   : > { %3369 = vpow2.f32 %v1437_v29  ;;  %v5540_v45 = vsub.f32 %v4539_v63, %v4563_v32 }
 0x44a   : > { %3371 = vpow2.f32 %v1439_v2  ;;  %v1475_v59 = vmul.f32 1.442695, %v5539_v62 }
 0x44b   : > { %3373 = vpow2.f32 %v1441_v39  ;;  %v1477_v0 = vmul.f32 1.442695, %v5540_v45 }
 0x44c   : > { %3375 = vpow2.f32 %v1443_v58  ;;  %v1463_v58 = vmul.f32 1.442695, %v1412_v8  ;;  %v1469_v8 = vmul.f32 1.442695, %v1415_v42 }
 0x44d   : > { %v4629_v27 = vpop.eup %3357  ;;  %3377 = vpow2.f32 %v1445_v31 }
 0x44e   : > { %v4631_v12 = vpop.eup %3359  ;;  %3379 = vpow2.f32 %v1447_v41 }
 0x44f   : > { %v4633_v36 = vpop.eup %3361  ;;  %3381 = vpow2.f32 %v1449_v57  ;;  %v1489_v43 = vadd.f32 %v4631_v12, %v4629_v27  ;;  %v1526_v34 = vpack.c.bf16 %v4631_v12, %v4629_v27 }
 0x450   : > { %v4639_v60 = vpop.eup %3363  ;;  %3383 = vpow2.f32 %v1451_v52 }
 0x451   : > { %v4641_v61 = vpop.eup %3365  ;;  %3385 = vpow2.f32 %v1453_v50  ;;  %v1490_v54 = vadd.f32 %v4633_v36, %v1489_v43  ;;  %v1527_v21 = vpack.c.bf16 %v4639_v60, %v4633_v36  ;;  %v5541_v50 = vsub.f32 %v4545_v1, %v4563_v32 }
 0x452   : > { %v4646_v30 = vpop.eup %3367  ;;  %3387 = vpow2.f32 %v1455_v6 }
 0x453   : > { %v4648_v29 = vpop.eup %3369  ;;  %3389 = vpow2.f32 %v1457_v10  ;;  %v1491_v2 = vadd.f32 %v4639_v60, %v1490_v54  ;;  %v1528_v26 = vpack.c.bf16 %v4646_v30, %v4641_v61  ;;  %v1479_v33 = vmul.f32 1.442695, %v5541_v50 }
 0x454   : > { %v4653_v39 = vpop.eup %3371  ;;  %3391 = vpow2.f32 %v1459_v44  ;;  %v5542_v10 = vsub.f32 %v4554_v49, %v4563_v32  ;;  %v5543_v54 = vsub.f32 %v4560_v48, %v4563_v32 }
 0x455   : > { %v4658_v31 = vpop.eup %3373  ;;  %3393 = vpow2.f32 %v1461_v11  ;;  %v1492_v56 = vadd.f32 %v4641_v61, %v1491_v2  ;;  %v1529_v41 = vpack.c.bf16 %v4653_v39, %v4648_v29 }
 0x456   : > { %v4666_v9 = vpop.eup %3375  ;;  %3395 = vpow2.f32 %v1463_v58  ;;  %v1481_v63 = vmul.f32 1.442695, %v5542_v10  ;;  %v1483_v1 = vmul.f32 1.442695, %v5543_v54 }
 0x457   : > { %v4671_v18 = vpop.eup %3377  ;;  %3397 = vpow2.f32 %v1465_v37  ;;  %v1493_v42 = vadd.f32 %v4646_v30, %v1492_v56  ;;  %v1530_v38 = vpack.c.bf16 %v4666_v9, %v4658_v31  ;;  %v5544_v37 = vsub.f32 %v4551_v3, %v4563_v32 }
 0x458   : > { %v4679_v14 = vpop.eup %3379  ;;  %3399 = vpow2.f32 %v1467_v51  ;;  %v5545_v56 = vsub.f32 %v4557_v16, %v4563_v32 }
 0x459   : > { %v4684_v40 = vpop.eup %3381  ;;  %3401 = vpow2.f32 %v1469_v8  ;;  %v1494_v13 = vadd.f32 %v4648_v29, %v1493_v42  ;;  %v1531_v57 = vpack.c.bf16 %v4679_v14, %v4671_v18  ;;  %v1485_v2 = vmul.f32 1.442695, %v5544_v37 }
 0x45a   : > { %v4692_v52 = vpop.eup %3383  ;;  %3403 = vpow2.f32 %v1471_v24  ;;  %v1487_v24 = vmul.f32 1.442695, %v5545_v56 }
 0x45b   : > { %v4697_v6 = vpop.eup %3385  ;;  %3405 = vpow2.f32 %v1473_v28  ;;  %v1495_v43 = vadd.f32 %v4653_v39, %v1494_v13  ;;  %v1532_v44 = vpack.c.bf16 %v4692_v52, %v4684_v40 }
 0x45c   : > { %v4705_v11 = vpop.eup %3387  ;;  %3407 = vpow2.f32 %v1475_v59 }
 0x45d   : > { %v3390_v58 = vpop.eup %3389  ;;  %3409 = vpow2.f32 %v1477_v0  ;;  %v1496_v49 = vadd.f32 %v4658_v31, %v1495_v43  ;;  %v1533_v51 = vpack.c.bf16 %v4705_v11, %v4697_v6 }
 0x45e   : > { %v3392_v8 = vpop.eup %3391  ;;  %3411 = vpow2.f32 %v1479_v33 }
 0x45f   : > { %v3394_v28 = vpop.eup %3393  ;;  %3413 = vpow2.f32 %v1481_v63  ;;  %v1497_v48 = vadd.f32 %v4666_v9, %v1496_v49  ;;  %v1534_v42 = vpack.c.bf16 %v3392_v8, %v3390_v58 }
 0x460   : > { %v3396_v62 = vpop.eup %3395  ;;  %3415 = vpow2.f32 %v1483_v1 }
 0x461   : > { %v3398_v3 = vpop.eup %3397  ;;  %3417 = vpow2.f32 %v1485_v2  ;;  %v1498_v59 = vadd.f32 %v4671_v18, %v1497_v48  ;;  %2918 = vmatprep.subr.bf16.mxu0 %v1534_v42  ;;  %v1535_v45 = vpack.c.bf16 %v3396_v62, %v3394_v28  ;;  %v5548_v18 = vld [vmem:[#allocation30_spill] sm:$0xff] }
 0x462   : > { %v3400_v0 = vpop.eup %3399  ;;  %3419 = vpow2.f32 %v1487_v24  ;;  %2919 = vmatpush3.bf16.msra.mxu0 %v1526_v34 }
 0x463   : > { %v3402_v32 = vpop.eup %3401  ;;  %v1499_v16 = vadd.f32 %v4679_v14, %v1498_v59  ;;  %2920 = vmatprep.subr.bf16.mxu0 %v1535_v45  ;;  %v1536_v13 = vpack.c.bf16 %v3400_v0, %v3398_v3  ;;  %v5547_v45 = vld [vmem:[#allocation14_spill] sm:$0xff] }
 0x464   : > { %v3404_v50 = vpop.eup %3403 }
 0x465   : > { %v3406_v33 = vpop.eup %3405  ;;  %v1500_v10 = vadd.f32 %v4684_v40, %v1499_v16  ;;  %v1537_v63 = vpack.c.bf16 %v3404_v50, %v3402_v32  ;;  %v5549_v40 = vld [vmem:[#allocation17_spill] sm:$0xff]  ;;  %v5555_v16 = vld [vmem:[#allocation23_spill] sm:$0xff] }
 0x466   : > { %v3408_v43 = vpop.eup %3407  ;;  %2921 = vmatpush3.bf16.msra.mxu0 %v1527_v21 }
 0x467   : > { %v3410_v54 = vpop.eup %3409  ;;  %v1501_v1 = vadd.f32 %v4692_v52, %v1500_v10  ;;  %2922 = vmatprep.subr.bf16.mxu0 %v1536_v13  ;;  %v1538_v27 = vpack.c.bf16 %v3408_v43, %v3406_v33  ;;  %v5556_v13 = vld [vmem:[#allocation25_spill] sm:$0xff] }
 0x468   : > { %v3412_v12 = vpop.eup %3411 }
 0x469   : > { %v3414_v34 = vpop.eup %3413  ;;  %v1502_v37 = vadd.f32 %v4697_v6, %v1501_v1  ;;  %v1539_v2 = vpack.c.bf16 %v3412_v12, %v3410_v54  ;;  %v5550_v6 = vld [vmem:[#allocation18_spill] sm:$0xff] }
 0x46a   : > { %v3416_v49 = vpop.eup %3415  ;;  %2923 = vmatpush3.bf16.msra.mxu0 %v1528_v26 }
 0x46b   : > { %v3418_v56 = vpop.eup %3417  ;;  %v1503_v24 = vadd.f32 %v4705_v11, %v1502_v37  ;;  %2924 = vmatprep.subr.bf16.mxu0 %v1537_v63  ;;  %v1540_v36 = vpack.c.bf16 %v3416_v49, %v3414_v34  ;;  %v5551_v11 = vld [vmem:[#allocation19_spill] sm:$0xff] }
 0x46c   : > { %v3420_v60 = vpop.eup %3419 }
 0x46d   : > { %v1504_v21 = vadd.f32 %v3390_v58, %v1503_v24  ;;  %v1541_v48 = vpack.c.bf16 %v3420_v60, %v3418_v56  ;;  %v5546_v58 = vld [vmem:[#allocation16_spill] sm:$0xff] }
 0x46e   : > { %2925 = vmatpush3.bf16.msra.mxu0 %v1529_v41  ;;  %v461_v29 = vadd.f32 %v5547_v45, %v5546_v58 }
 0x46f   : > { %v1505_v42 = vadd.f32 %v3392_v8, %v1504_v21  ;;  %2926 = vmatprep.subr.bf16.mxu0 %v1538_v27 }
 0x470   : > { %v1584_v31 = vpack.c.bf16 %v461_v29, %v461_v29 }
 0x471   : > { %v1506_v59 = vadd.f32 %v3394_v28, %v1505_v42 }
 0x472   : > { %2927 = vmatpush3.bf16.msra.mxu0 %v1530_v38  ;;  %v1110_v38 = vpack.c.bf16 %v5548_v18, %v5548_v18 }
 0x473   : > { %v1507_v61 = vadd.f32 %v3396_v62, %v1506_v59  ;;  %2928 = vmatprep.subr.bf16.mxu0 %v1539_v2 }
 0x475   : > { %v1508_v30 = vadd.f32 %v3398_v3, %v1507_v61  ;;  %v5552_v3 = vld [vmem:[#allocation20_spill] sm:$0xff] }
 0x476   : > { %2929 = vmatpush3.bf16.msra.mxu0 %v1531_v57  ;;  %v1670_v57 = vsel %vm714_vm1, %v1584_v31, 0 }
 0x477   : > { %v1509_v26 = vadd.f32 %v3400_v0, %v1508_v30  ;;  %2930 = vmatprep.subr.bf16.mxu0 %v1540_v36  ;;  %v5553_v0 = vld [vmem:[#allocation21_spill] sm:$0xff] }
 0x479   : > { %v1510_v39 = vadd.f32 %v3402_v32, %v1509_v26  ;;  %v5554_v32 = vld [vmem:[#allocation22_spill] sm:$0xff] }
 0x47a   : > { %2931 = vmatpush3.bf16.msra.mxu0 %v1532_v44 }
 0x47b   : > { %v1511_v41 = vadd.f32 %v3404_v50, %v1510_v39  ;;  %2932 = vmatprep.subr.bf16.mxu0 %v1541_v48 }
 0x47d   : > { %v1512_v9 = vadd.f32 %v3406_v33, %v1511_v41 }
 0x47e   : > { %2933 = vmatpush3.bf16.msra.mxu0 %v1533_v51 }
 0x47f   : > { %v1513_v14 = vadd.f32 %v3408_v43, %v1512_v9  ;;  %3176 = vmatprep.subr.msk.bf16.mxu0 %vm714_vm1, %v1584_v31 }
 0x481   : > { %v1514_v8 = vadd.f32 %v3410_v54, %v1513_v14  ;;  %1575 = vmatmul.mubr.bf16.vlgmr.msra.gmra.mrb[36].mxu0 %v1110_v38 }
 0x482   : > { %3099 = vmatpush3.bf16.msra.mxu0 %v1670_v57  ;;  %3100 = vmatprep.mubr.msk.bf16.mxu0 %vm665_vm2, %v5549_v40 }
 0x483   : > { %v1515_v52 = vadd.f32 %v3412_v12, %v1514_v8 }
 0x485   : > { %v1516_v44 = vadd.f32 %v3414_v34, %v1515_v52 }
 0x487   : > { %v1517_v28 = vadd.f32 %v3416_v49, %v1516_v44 }
 0x489   : > { %v1518_v62 = vadd.f32 %v3418_v56, %v1517_v28  ;;  %3101 = vmatmul.mubr.msk.bf16.vlgmr.msra.gmra.mrb[40].mxu0 %vm665_vm2, %v5550_v6 }
 0x48a   : > { %3104 = vmatprep.mubr.msk.bf16.mxu0 %vm665_vm2, %v5551_v11 }
 0x48b   : > { %v1519_v51 = vadd.f32 %v3420_v60, %v1518_v62 }
 0x491   : > { %3105 = vmatmul.mubr.msk.bf16.gmra.mrb[44].mxu0 %vm665_vm2, %v5552_v3 }
 0x492   : > { %3108 = vmatprep.mubr.msk.bf16.mxu0 %vm665_vm2, %v5553_v0 }
 0x499   : > { %3109 = vmatmul.mubr.msk.bf16.gmra.mrb[48].mxu0 %vm665_vm2, %v5554_v32 }
 0x49a   : > { %3112 = vmatprep.mubr.msk.bf16.mxu0 %vm665_vm2, %v5555_v16 }
 0x4a1   : > { %3113 = vmatmul.mubr.msk.bf16.gmra.mrb[52].mxu0 %vm665_vm2, %v5556_v13 }
 0x4a2   : > { %3116 = vmatprep.mubr.msk.bf16.mxu0 %vm665_vm2, %v4398_v4  ;;  %v626_v4 = vadd.f32 %v4208_v5, %v4432_v20 }
 0x4a4   : > { %v2065_v50 = vpack.c.bf16 %v626_v4, %v626_v4 }
 0x4a9   : > { %3117 = vmatmul.mubr.msk.bf16.gmra.mrb[56].mxu0 %vm665_vm2, %v4406_v35  ;;  %v1520_v35 = vrot.slane %v1519_v51, 4 }
 0x4aa   : > { %3120 = vmatprep.mubr.msk.bf16.mxu0 %vm665_vm2, %v4414_v23 }
 0x4ab   : > { %v1521_v23 = vadd.f32 %v1520_v35, %v1519_v51 }
 0x4b1   : > { %3121 = vmatmul.mubr.msk.bf16.gmra.mrb[60].mxu0 %vm665_vm2, %v4420_v15  ;;  %v1522_v15 = vrot.slane %v1521_v23, 2 }
 0x4b2   : > { %3124 = vmatprep.mubr.msk.bf16.mxu0 %vm665_vm2, %v4426_v17 }
 0x4b3   : > { %v1523_v33 = vadd.f32 %v1522_v15, %v1521_v23 }
 0x4b5   : > { %v1524_v10 = vrot.slane %v1523_v33, 1 }
 0x4b7   : > { %v1525_v17 = vadd.f32 %v1524_v10, %v1523_v33 }
 0x4b9   : > { %3125 = vmatmul.mubr.msk.bf16.gmra.mrb[64].mxu0 %vm665_vm2, %v4434_v22  ;;  %3421 = vrcp.f32 %v1525_v17 }
 0x4ba   : > { %3128 = vmatprep.mubr.msk.bf16.mxu0 %vm665_vm2, %v4444_v25 }
 0x4c1   : > { %3129 = vmatmul.mubr.msk.bf16.gmra.mrb[68].mxu0 %vm665_vm2, %v4448_v46 }
 0x4c2   : > { %2528 = vmatprep.mubr.bf16.mxu0 %v2065_v50 }
 0x4c3   : > { %v3422_v25 = vpop.eup %3421 }
 0x554   : > { %v2934_v63 = vpop.f32.mrb[36].mxu0 }
 0x555   : > { %v2935_v22 = vpop.f32.mrb[37].mxu0 }
 0x556   : > { %v2936_v43 = vadd.f32 %v2935_v22, %v2934_v63  ;;  %v2937_v54 = vpop.f32.mrb[38].mxu0 }
 0x557   : > { %v2938_v1 = vpop.f32.mrb[39].mxu0 }
 0x558   : > { %v1583_v27 = vmul.f32 %v3422_v25, %v2936_v43 }
 0x55a   : > { %v4791_v5 = vpack.c.bf16 %v1583_v27, %v4465_v7 }
 0x55c   : > { %v4793_v20 = vpop.f32.mrb[40].mxu0 }
 0x55d   : > { %v4795_v46 = vpop.f32.mrb[41].mxu0 }
 0x55e   : > { %v4797_v12 = vpop.f32.mrb[42].mxu0 }
 0x55f   : > { %v4799_v34 = vpop.f32.mrb[43].mxu0 }
 0x564   : > { %v4801_v37 = vpop.f32.mrb[44].mxu0 }
 0x565   : > { %v1835_v2 = vmax.f32 %v4793_v20, %v4801_v37  ;;  %v4805_v49 = vpop.f32.mrb[45].mxu0 }
 0x566   : > { %v1833_v56 = vmax.f32 %v4795_v46, %v4805_v49  ;;  %v4809_v7 = vpop.f32.mrb[46].mxu0 }
 0x567   : > { %v1836_v24 = vmax.f32 %v4797_v12, %v4809_v7  ;;  %v4813_v36 = vpop.f32.mrb[47].mxu0 }
 0x568   : > { %v1834_v60 = vmax.f32 %v4799_v34, %v4813_v36 }
 0x56c   : > { %v4817_v21 = vpop.f32.mrb[48].mxu0 }
 0x56d   : > { %v1839_v48 = vmax.f32 %v1835_v2, %v4817_v21  ;;  %v4820_v42 = vpop.f32.mrb[49].mxu0 }
 0x56e   : > { %v1837_v59 = vmax.f32 %v1833_v56, %v4820_v42  ;;  %v4823_v61 = vpop.f32.mrb[50].mxu0 }
 0x56f   : > { %v1840_v30 = vmax.f32 %v1836_v24, %v4823_v61  ;;  %v4826_v26 = vpop.f32.mrb[51].mxu0 }
 0x570   : > { %v1838_v58 = vmax.f32 %v1834_v60, %v4826_v26 }
 0x574   : > { %v4829_v45 = vpop.f32.mrb[52].mxu0 }
 0x575   : > { %v1843_v29 = vmax.f32 %v1839_v48, %v4829_v45  ;;  %v4832_v39 = vpop.f32.mrb[53].mxu0 }
 0x576   : > { %v1841_v41 = vmax.f32 %v1837_v59, %v4832_v39  ;;  %v4835_v31 = vpop.f32.mrb[54].mxu0 }
 0x577   : > { %v1844_v9 = vmax.f32 %v1840_v30, %v4835_v31  ;;  %v4838_v18 = vpop.f32.mrb[55].mxu0 }
 0x578   : > { %v1842_v38 = vmax.f32 %v1838_v58, %v4838_v18 }
 0x57c   : > { %v4841_v14 = vpop.f32.mrb[56].mxu0 }
 0x57d   : > { %v1847_v57 = vmax.f32 %v1843_v29, %v4841_v14  ;;  %v4844_v8 = vpop.f32.mrb[57].mxu0 }
 0x57e   : > { %v1845_v40 = vmax.f32 %v1841_v41, %v4844_v8  ;;  %v4847_v52 = vpop.f32.mrb[58].mxu0 }
 0x57f   : > { %v1848_v44 = vmax.f32 %v1844_v9, %v4847_v52  ;;  %v4850_v28 = vpop.f32.mrb[59].mxu0 }
 0x580   : > { %v1846_v62 = vmax.f32 %v1842_v38, %v4850_v28 }
 0x584   : > { %v4853_v6 = vpop.f32.mrb[60].mxu0 }
 0x585   : > { %v1851_v11 = vmax.f32 %v1847_v57, %v4853_v6  ;;  %v4856_v51 = vpop.f32.mrb[61].mxu0 }
 0x586   : > { %v1849_v3 = vmax.f32 %v1845_v40, %v4856_v51  ;;  %v4859_v0 = vpop.f32.mrb[62].mxu0 }
 0x587   : > { %v1852_v32 = vmax.f32 %v1848_v44, %v4859_v0  ;;  %v4862_v16 = vpop.f32.mrb[63].mxu0 }
 0x588   : > { %v1850_v13 = vmax.f32 %v1846_v62, %v4862_v16 }
 0x58c   : > { %v4865_v4 = vpop.f32.mrb[64].mxu0 }
 0x58d   : > { %v1855_v50 = vmax.f32 %v1851_v11, %v4865_v4  ;;  %v4868_v35 = vpop.f32.mrb[65].mxu0 }
 0x58e   : > { %v1853_v23 = vmax.f32 %v1849_v3, %v4868_v35  ;;  %v4871_v15 = vpop.f32.mrb[66].mxu0 }
 0x58f   : > { %v1856_v33 = vmax.f32 %v1852_v32, %v4871_v15  ;;  %v4874_v10 = vpop.f32.mrb[67].mxu0 }
 0x590   : > { %v1854_v17 = vmax.f32 %v1850_v13, %v4874_v10 }
 0x594   : > { %v4877_v63 = vpop.f32.mrb[68].mxu0 }
 0x595   : > { %v1859_v22 = vmax.f32 %v1855_v50, %v4877_v63  ;;  %v4880_v43 = vpop.f32.mrb[69].mxu0 }
 0x596   : > { %v1857_v54 = vmax.f32 %v1853_v23, %v4880_v43  ;;  %v4883_v25 = vpop.f32.mrb[70].mxu0 }
 0x597   : > { %v1860_v1 = vmax.f32 %v1856_v33, %v4883_v25  ;;  %v4886_v27 = vpop.f32.mrb[71].mxu0 }
 0x598   : > { %v1858_v2 = vmax.f32 %v1854_v17, %v4886_v27 }
 0x599   : > { %v1862_v56 = vmax.f32 %v1859_v22, %v1860_v1 }
 0x59a   : > { %v1861_v24 = vmax.f32 %v1857_v54, %v1858_v2 }
 0x59c   : > { %v1863_v60 = vmax.f32 %v1861_v24, %v1862_v56 }
 0x59e   : > { %v1864_v48 = vrot.slane %v1863_v60, 4 }
 0x5a0   : > { %v1865_v59 = vmax.f32 %v1863_v60, %v1864_v48 }
 0x5a2   : > { %v1866_v30 = vrot.slane %v1865_v59, 2 }
 0x5a4   : > { %v1867_v58 = vmax.f32 %v1865_v59, %v1866_v30 }
 0x5a6   : > { %v1868_v29 = vrot.slane %v1867_v58, 1 }
 0x5a8   : > { %v4889_v41 = vmax.f32 %v1867_v58, %v1868_v29 }
 0x5aa   : > { %v1870_v9 = vsub.f32 %v4795_v46, %v4889_v41  ;;  %v1871_v38 = vsub.f32 %v4799_v34, %v4889_v41  ;;  %v1872_v57 = vsub.f32 %v4793_v20, %v4889_v41  ;;  %v1873_v40 = vsub.f32 %v4797_v12, %v4889_v41 }
 0x5ab   : > { %v1874_v44 = vsub.f32 %v4805_v49, %v4889_v41  ;;  %v1875_v62 = vsub.f32 %v4813_v36, %v4889_v41  ;;  %v1876_v11 = vsub.f32 %v4801_v37, %v4889_v41  ;;  %v1877_v46 = vsub.f32 %v4809_v7, %v4889_v41 }
 0x5ac   : > { %v1878_v34 = vsub.f32 %v4820_v42, %v4889_v41  ;;  %v1879_v20 = vsub.f32 %v4826_v26, %v4889_v41  ;;  %v1880_v12 = vsub.f32 %v4817_v21, %v4889_v41  ;;  %v1881_v49 = vsub.f32 %v4823_v61, %v4889_v41 }
 0x5ad   : > { %v1882_v36 = vsub.f32 %v4832_v39, %v4889_v41  ;;  %v1883_v37 = vsub.f32 %v4838_v18, %v4889_v41  ;;  %v1884_v7 = vsub.f32 %v4829_v45, %v4889_v41  ;;  %v1885_v42 = vsub.f32 %v4835_v31, %v4889_v41 }
 0x5ae   : > { %v1886_v26 = vsub.f32 %v4844_v8, %v4889_v41  ;;  %v1887_v21 = vsub.f32 %v4850_v28, %v4889_v41  ;;  %v1888_v61 = vsub.f32 %v4841_v14, %v4889_v41  ;;  %v1889_v39 = vsub.f32 %v4847_v52, %v4889_v41 }
 0x5af   : > { %v1890_v18 = vsub.f32 %v4856_v51, %v4889_v41  ;;  %v1891_v45 = vsub.f32 %v4862_v16, %v4889_v41  ;;  %v1892_v31 = vsub.f32 %v4853_v6, %v4889_v41  ;;  %v1893_v8 = vsub.f32 %v4859_v0, %v4889_v41 }
 0x5b0   : > { %v1894_v28 = vsub.f32 %v4868_v35, %v4889_v41  ;;  %v1895_v14 = vsub.f32 %v4874_v10, %v4889_v41  ;;  %v1896_v52 = vsub.f32 %v4865_v4, %v4889_v41  ;;  %v1897_v51 = vsub.f32 %v4871_v15, %v4889_v41 }
 0x5b1   : > { %v1898_v3 = vsub.f32 %v4880_v43, %v4889_v41  ;;  %v1899_v32 = vsub.f32 %v4886_v27, %v4889_v41  ;;  %v1900_v13 = vsub.f32 %v4877_v63, %v4889_v41  ;;  %v1901_v50 = vsub.f32 %v4883_v25, %v4889_v41 }
 0x5b2   : > { %v1902_v23 = vmul.f32 1.442695, %v1870_v9  ;;  %v1904_v33 = vmul.f32 1.442695, %v1871_v38  ;;  %v1906_v17 = vmul.f32 1.442695, %v1872_v57 }
 0x5b3   : > { %v1908_v22 = vmul.f32 1.442695, %v1873_v40  ;;  %v1910_v54 = vmul.f32 1.442695, %v1874_v44  ;;  %v1912_v1 = vmul.f32 1.442695, %v1875_v62 }
 0x5b4   : > { %3423 = vpow2.f32 %v1902_v23  ;;  %v1914_v2 = vmul.f32 1.442695, %v1876_v11  ;;  %v1916_v56 = vmul.f32 1.442695, %v1877_v46  ;;  %v1918_v24 = vmul.f32 1.442695, %v1878_v34 }
 0x5b5   : > { %3425 = vpow2.f32 %v1904_v33  ;;  %v1920_v60 = vmul.f32 1.442695, %v1879_v20  ;;  %v1922_v48 = vmul.f32 1.442695, %v1880_v12  ;;  %v1924_v59 = vmul.f32 1.442695, %v1881_v49 }
 0x5b6   : > { %3427 = vpow2.f32 %v1906_v17  ;;  %v1926_v30 = vmul.f32 1.442695, %v1882_v36  ;;  %v1928_v58 = vmul.f32 1.442695, %v1883_v37  ;;  %v1930_v9 = vmul.f32 1.442695, %v1884_v7 }
 0x5b7   : > { %3429 = vpow2.f32 %v1908_v22  ;;  %v1932_v57 = vmul.f32 1.442695, %v1885_v42  ;;  %v1934_v44 = vmul.f32 1.442695, %v1886_v26  ;;  %v1936_v34 = vmul.f32 1.442695, %v1887_v21 }
 0x5b8   : > { %3431 = vpow2.f32 %v1910_v54  ;;  %v1938_v12 = vmul.f32 1.442695, %v1888_v61  ;;  %v1940_v7 = vmul.f32 1.442695, %v1889_v39  ;;  %v1942_v26 = vmul.f32 1.442695, %v1890_v18 }
 0x5b9   : > { %3433 = vpow2.f32 %v1912_v1  ;;  %v1944_v61 = vmul.f32 1.442695, %v1891_v45  ;;  %v1946_v39 = vmul.f32 1.442695, %v1892_v31  ;;  %v1948_v16 = vmul.f32 1.442695, %v1893_v8 }
 0x5ba   : > { %3435 = vpow2.f32 %v1914_v2  ;;  %v1950_v6 = vmul.f32 1.442695, %v1894_v28  ;;  %v1952_v0 = vmul.f32 1.442695, %v1895_v14  ;;  %v1954_v35 = vmul.f32 1.442695, %v1896_v52 }
 0x5bb   : > { %3437 = vpow2.f32 %v1916_v56  ;;  %v1956_v10 = vmul.f32 1.442695, %v1897_v51  ;;  %v1958_v4 = vmul.f32 1.442695, %v1898_v3  ;;  %v1960_v15 = vmul.f32 1.442695, %v1899_v32 }
 0x5bc   : > { %3439 = vpow2.f32 %v1918_v24 }
 0x5bd   : > { %3441 = vpow2.f32 %v1920_v60 }
 0x5be   : > { %v4955_v29 = vpop.eup %3423  ;;  %3443 = vpow2.f32 %v1922_v48 }
 0x5bf   : > { %v4957_v38 = vpop.eup %3425  ;;  %3445 = vpow2.f32 %v1924_v59  ;;  %v1962_v59 = vmul.f32 1.442695, %v1900_v13 }
 0x5c0   : > { %v4959_v40 = vpop.eup %3427  ;;  %3447 = vpow2.f32 %v1926_v30  ;;  %v1966_v62 = vadd.f32 %v4957_v38, %v4955_v29  ;;  %v2003_v11 = vpack.c.bf16 %v4957_v38, %v4955_v29 }
 0x5c1   : > { %v4965_v46 = vpop.eup %3429  ;;  %3449 = vpow2.f32 %v1928_v58  ;;  %v1964_v58 = vmul.f32 1.442695, %v1901_v50 }
 0x5c2   : > { %v4967_v20 = vpop.eup %3431  ;;  %3451 = vpow2.f32 %v1930_v9  ;;  %v1967_v49 = vadd.f32 %v4959_v40, %v1966_v62  ;;  %v2004_v36 = vpack.c.bf16 %v4965_v46, %v4959_v40 }
 0x5c3   : > { %v4972_v37 = vpop.eup %3433  ;;  %3453 = vpow2.f32 %v1932_v57 }
 0x5c4   : > { %v4974_v42 = vpop.eup %3435  ;;  %3455 = vpow2.f32 %v1934_v44  ;;  %v1968_v23 = vadd.f32 %v4965_v46, %v1967_v49  ;;  %v2005_v21 = vpack.c.bf16 %v4972_v37, %v4967_v20 }
 0x5c5   : > { %v4979_v33 = vpop.eup %3437  ;;  %3457 = vpow2.f32 %v1936_v34 }
 0x5c6   : > { %v4984_v17 = vpop.eup %3439  ;;  %3459 = vpow2.f32 %v1938_v12  ;;  %v1969_v18 = vadd.f32 %v4967_v20, %v1968_v23  ;;  %v2006_v22 = vpack.c.bf16 %v4979_v33, %v4974_v42 }
 0x5c7   : > { %v4992_v54 = vpop.eup %3441  ;;  %3461 = vpow2.f32 %v1940_v7 }
 0x5c8   : > { %v4997_v45 = vpop.eup %3443  ;;  %3463 = vpow2.f32 %v1942_v26  ;;  %v1970_v31 = vadd.f32 %v4972_v37, %v1969_v18  ;;  %v2007_v1 = vpack.c.bf16 %v4992_v54, %v4984_v17  ;;  %v2074_v37 = vpop.trf.xlu1 }
 0x5c9   : > { %v5005_v2 = vpop.eup %3445  ;;  %3465 = vpow2.f32 %v1944_v61 }
 0x5ca   : > { %v5010_v8 = vpop.eup %3447  ;;  %3467 = vpow2.f32 %v1946_v39  ;;  %v1971_v28 = vadd.f32 %v4974_v42, %v1970_v31  ;;  %v2008_v56 = vpack.c.bf16 %v5005_v2, %v4997_v45  ;;  %v5557_v42 = vld [vmem:[#allocation15_spill] sm:$0xff] }
 0x5cb   : > { %v5018_v24 = vpop.eup %3449  ;;  %3469 = vpow2.f32 %v1948_v16 }
 0x5cc   : > { %v5023_v14 = vpop.eup %3451  ;;  %3471 = vpow2.f32 %v1950_v6  ;;  %v1972_v52 = vadd.f32 %v4979_v33, %v1971_v28  ;;  %v2009_v60 = vpack.c.bf16 %v5018_v24, %v5010_v8  ;;  %v464_v33 = vadd.f32 %v5557_v42, %v4368_v47 }
 0x5cd   : > { %v5031_v48 = vpop.eup %3453  ;;  %3473 = vpow2.f32 %v1952_v0 }
 0x5ce   : > { %v3456_v51 = vpop.eup %3455  ;;  %3475 = vpow2.f32 %v1954_v35  ;;  %v1973_v43 = vadd.f32 %v4984_v17, %v1972_v52  ;;  %v2010_v3 = vpack.c.bf16 %v5031_v48, %v5023_v14  ;;  %v620_v17 = vadd.f32 %v4176_v19, %v4452_v53 }
 0x5cf   : > { %v3458_v30 = vpop.eup %3457  ;;  %3477 = vpow2.f32 %v1956_v10 }
 0x5d0   : > { %v3460_v9 = vpop.eup %3459  ;;  %3479 = vpow2.f32 %v1958_v4  ;;  %v1974_v27 = vadd.f32 %v4992_v54, %v1973_v43  ;;  %v2011_v32 = vpack.c.bf16 %v3458_v30, %v3456_v51  ;;  %v2075_v54 = vpop.trf.xlu1  ;;  %v2061_v4 = vpack.c.bf16 %v464_v33, %v464_v33 }
 0x5d1   : > { %v3462_v57 = vpop.eup %3461  ;;  %3481 = vpow2.f32 %v1960_v15 }
 0x5d2   : > { %v3464_v63 = vpop.eup %3463  ;;  %3483 = vpow2.f32 %v1962_v59  ;;  %v1975_v13 = vadd.f32 %v4997_v45, %v1974_v27  ;;  %2957 = vmatprep.subr.bf16.mxu1 %v2011_v32  ;;  %v2012_v44 = vpack.c.bf16 %v3462_v57, %v3460_v9  ;;  %v1587_v45 = vpack.c.bf16 %v620_v17, %v620_v17  ;;  %v5562_v27 = vld [vmem:[#allocation35_spill] sm:$0xff]  ;;  %v5563_v32 = vld [vmem:[#allocation36_spill] sm:$0xff] }
 0x5d3   : > { %v3466_v62 = vpop.eup %3465  ;;  %3485 = vpow2.f32 %v1964_v58  ;;  %2958 = vmatpush3.bf16.msra.mxu1 %v2003_v11  ;;  %v2147_v47 = vsel %vm714_vm1, %v2061_v4, 0  ;;  %v5560_v58 = vld [vmem:[#allocation33_spill] sm:$0xff] }
 0x5d4   : > { %v3468_v25 = vpop.eup %3467  ;;  %v1976_v41 = vadd.f32 %v5005_v2, %v1975_v13  ;;  %2959 = vmatprep.subr.bf16.mxu1 %v2012_v44  ;;  %v2013_v50 = vpack.c.bf16 %v3466_v62, %v3464_v63 }
 0x5d5   : > { %v3470_v34 = vpop.eup %3469 }
 0x5d6   : > { %v3472_v12 = vpop.eup %3471  ;;  %v1977_v49 = vadd.f32 %v5010_v8, %v1976_v41  ;;  %v2014_v7 = vpack.c.bf16 %v3470_v34, %v3468_v25  ;;  %v2076_v8 = vpop.trf.xlu1 }
 0x5d7   : > { %v3474_v26 = vpop.eup %3473  ;;  %2960 = vmatpush3.bf16.msra.mxu1 %v2004_v36 }
 0x5d8   : > { %v3476_v23 = vpop.eup %3475  ;;  %v1978_v61 = vadd.f32 %v5018_v24, %v1977_v49  ;;  %2961 = vmatprep.subr.bf16.mxu1 %v2013_v50  ;;  %v2015_v29 = vpack.c.bf16 %v3474_v26, %v3472_v12 }
 0x5d9   : > { %v3478_v38 = vpop.eup %3477 }
 0x5da   : > { %v3480_v11 = vpop.eup %3479  ;;  %v1979_v39 = vadd.f32 %v5023_v14, %v1978_v61  ;;  %v2016_v18 = vpack.c.bf16 %v3478_v38, %v3476_v23  ;;  %v2077_v24 = vpop.trf.xlu1 }
 0x5db   : > { %v3482_v16 = vpop.eup %3481  ;;  %2962 = vmatpush3.bf16.msra.mxu1 %v2005_v21 }
 0x5dc   : > { %v3484_v6 = vpop.eup %3483  ;;  %v1980_v31 = vadd.f32 %v5031_v48, %v1979_v39  ;;  %2963 = vmatprep.subr.bf16.mxu1 %v2014_v7  ;;  %v2017_v40 = vpack.c.bf16 %v3482_v16, %v3480_v11 }
 0x5dd   : > { %v3486_v46 = vpop.eup %3485 }
 0x5de   : > { %v1981_v36 = vadd.f32 %v3456_v51, %v1980_v31  ;;  %v2018_v0 = vpack.c.bf16 %v3486_v46, %v3484_v6  ;;  %v2078_v48 = vpop.trf.xlu1 }
 0x5df   : > { %2964 = vmatpush3.bf16.msra.mxu1 %v2006_v22 }
 0x5e0   : > { %v1982_v35 = vadd.f32 %v3458_v30, %v1981_v36  ;;  %2965 = vmatprep.subr.bf16.mxu1 %v2015_v29  ;;  %v5559_v30 = vld [vmem:[#allocation32_spill] sm:$0xff] }
 0x5e2   : > { %v1983_v28 = vadd.f32 %v3460_v9, %v1982_v35  ;;  %v2079_v51 = vpop.trf.xlu1  ;;  %v5561_v9 = vld [vmem:[#allocation34_spill] sm:$0xff] }
 0x5e3   : > { %2966 = vmatpush3.bf16.msra.mxu1 %v2007_v1 }
 0x5e4   : > { %v1984_v20 = vadd.f32 %v3462_v57, %v1983_v28  ;;  %2967 = vmatprep.subr.bf16.mxu1 %v2016_v18  ;;  %v5564_v57 = vld [vmem:[#allocation37_spill] sm:$0xff] }
 0x5e6   : > { %v1985_v21 = vadd.f32 %v3464_v63, %v1984_v20  ;;  %v2080_v59 = vpop.trf.xlu1 }
 0x5e7   : > { %2968 = vmatpush3.bf16.msra.mxu1 %v2008_v56 }
 0x5e8   : > { %v1986_v10 = vadd.f32 %v3466_v62, %v1985_v21  ;;  %2969 = vmatprep.subr.bf16.mxu1 %v2017_v40 }
 0x5ea   : > { %v1987_v22 = vadd.f32 %v3468_v25, %v1986_v10  ;;  %v2081_v43 = vpop.trf.xlu1 }
 0x5eb   : > { %2970 = vmatpush3.bf16.msra.mxu1 %v2009_v60 }
 0x5ec   : > { %v1988_v1 = vadd.f32 %v3470_v34, %v1987_v22  ;;  %2971 = vmatprep.subr.bf16.mxu1 %v2018_v0 }
 0x5ee   : > { %v1989_v52 = vadd.f32 %v3472_v12, %v1988_v1 }
 0x5ef   : > { %2972 = vmatpush3.bf16.msra.mxu1 %v2010_v3  ;;  %v5558_v3 = vld [vmem:[#allocation31_spill] sm:$0xff] }
 0x5f0   : > { %v1990_v2 = vadd.f32 %v3474_v26, %v1989_v52  ;;  %3177 = vmatprep.subr.msk.bf16.mxu1 %vm714_vm1, %v2061_v4 }
 0x5f2   : > { %v1991_v56 = vadd.f32 %v3476_v23, %v1990_v2  ;;  %2052 = vmatmul.mubr.bf16.vlgmr.msra.gmra.mrb[52].mxu1 %v1587_v45 }
 0x5f3   : > { %3133 = vmatpush3.bf16.msra.mxu1 %v2147_v47  ;;  %3134 = vmatprep.mubr.msk.bf16.mxu1 %vm665_vm2, %v2074_v37 }
 0x5f4   : > { %v1992_v19 = vadd.f32 %v3478_v38, %v1991_v56 }
 0x5f6   : > { %v1993_v53 = vadd.f32 %v3480_v11, %v1992_v19 }
 0x5f8   : > { %v1994_v60 = vadd.f32 %v3482_v16, %v1993_v53 }
 0x5fa   : > { %v1995_v15 = vadd.f32 %v3484_v6, %v1994_v60  ;;  %3135 = vmatmul.mubr.msk.bf16.vlgmr.msra.gmra.mrb[56].mxu1 %vm665_vm2, %v2075_v54 }
 0x5fb   : > { %3138 = vmatprep.mubr.msk.bf16.mxu1 %vm665_vm2, %v2076_v8 }
 0x5fc   : > { %v1996_v14 = vadd.f32 %v3486_v46, %v1995_v15 }
 0x602   : > { %3139 = vmatmul.mubr.msk.bf16.gmra.mrb[60].mxu1 %vm665_vm2, %v2077_v24 }
 0x603   : > { %3142 = vmatprep.mubr.msk.bf16.mxu1 %vm665_vm2, %v2078_v48 }
 0x60a   : > { %3143 = vmatmul.mubr.msk.bf16.gmra.mrb[64].mxu1 %vm665_vm2, %v2079_v51 }
 0x60b   : > { %3146 = vmatprep.mubr.msk.bf16.mxu1 %vm665_vm2, %v2080_v59 }
 0x612   : > { %3147 = vmatmul.mubr.msk.bf16.gmra.mrb[68].mxu1 %vm665_vm2, %v2081_v43 }
 0x613   : > { %3150 = vmatprep.mubr.msk.bf16.mxu1 %vm665_vm2, %v4373_v55  ;;  %v1997_v55 = vrot.slane %v1996_v14, 4 }
 0x615   : > { %v1998_v63 = vadd.f32 %v1997_v55, %v1996_v14 }
 0x617   : > { %v1999_v13 = vrot.slane %v1998_v63, 2 }
 0x619   : > { %v2000_v44 = vadd.f32 %v1999_v13, %v1998_v63 }
 0x61a   : > { %3151 = vmatmul.mubr.msk.bf16.gmra.mrb[72].mxu1 %vm665_vm2, %v5558_v3 }
 0x61b   : > { %3154 = vmatprep.mubr.msk.bf16.mxu1 %vm665_vm2, %v5559_v30  ;;  %v2001_v62 = vrot.slane %v2000_v44, 1 }
 0x61d   : > { %v2002_v25 = vadd.f32 %v2001_v62, %v2000_v44 }
 0x61f   : > { %3487 = vrcp.f32 %v2002_v25 }
 0x622   : > { %3155 = vmatmul.mubr.msk.bf16.gmra.mrb[76].mxu1 %vm665_vm2, %v5560_v58 }
 0x623   : > { %3158 = vmatprep.mubr.msk.bf16.mxu1 %vm665_vm2, %v5561_v9 }
 0x629   : > { %v3488_v49 = vpop.eup %3487 }
 0x62a   : > { %3159 = vmatmul.mubr.msk.bf16.gmra.mrb[80].mxu1 %vm665_vm2, %v5562_v27 }
 0x62b   : > { %3162 = vmatprep.mubr.msk.bf16.mxu1 %vm665_vm2, %v5563_v32 }
 0x632   : > { %3163 = vmatmul.mubr.msk.bf16.gmra.mrb[84].mxu1 %vm665_vm2, %v5564_v57 }
 0x6c5   : > { %v2973_v41 = vpop.f32.mrb[52].mxu1 }
 0x6c6   : > { %v2974_v50 = vpop.f32.mrb[53].mxu1 }
 0x6c7   : > { %v2975_v34 = vadd.f32 %v2974_v50, %v2973_v41  ;;  %v2976_v12 = vpop.f32.mrb[54].mxu1 }
 0x6c8   : > { %v2977_v7 = vpop.f32.mrb[55].mxu1 }
 0x6c9   : > { %v5106_v26 = vmul.f32 %v3488_v49, %v2975_v34 }
 0x6cd   : > { %v5108_v23 = vpop.f32.mrb[56].mxu1 }
 0x6ce   : > { %v5110_v61 = vpop.f32.mrb[57].mxu1 }
 0x6cf   : > { %v5112_v29 = vpop.f32.mrb[58].mxu1 }
 0x6d0   : > { %v5114_v38 = vpop.f32.mrb[59].mxu1 }
 0x6d5   : > { %v5116_v11 = vpop.f32.mrb[60].mxu1 }
 0x6d6   : > { %v2312_v39 = vmax.f32 %v5108_v23, %v5116_v11  ;;  %v5120_v18 = vpop.f32.mrb[61].mxu1 }
 0x6d7   : > { %v2310_v16 = vmax.f32 %v5110_v61, %v5120_v18  ;;  %v5124_v6 = vpop.f32.mrb[62].mxu1 }
 0x6d8   : > { %v2313_v31 = vmax.f32 %v5112_v29, %v5124_v6  ;;  %v5128_v40 = vpop.f32.mrb[63].mxu1 }
 0x6d9   : > { %v2311_v46 = vmax.f32 %v5114_v38, %v5128_v40 }
 0x6dd   : > { %v5132_v36 = vpop.f32.mrb[64].mxu1 }
 0x6de   : > { %v2316_v0 = vmax.f32 %v2312_v39, %v5132_v36  ;;  %v5135_v35 = vpop.f32.mrb[65].mxu1 }
 0x6df   : > { %v2314_v28 = vmax.f32 %v2310_v16, %v5135_v35  ;;  %v5138_v20 = vpop.f32.mrb[66].mxu1 }
 0x6e0   : > { %v2317_v37 = vmax.f32 %v2313_v31, %v5138_v20  ;;  %v5141_v21 = vpop.f32.mrb[67].mxu1 }
 0x6e1   : > { %v2315_v10 = vmax.f32 %v2311_v46, %v5141_v21 }
 0x6e5   : > { %v5144_v42 = vpop.f32.mrb[68].mxu1 }
 0x6e6   : > { %v2320_v33 = vmax.f32 %v2316_v0, %v5144_v42  ;;  %v5147_v22 = vpop.f32.mrb[69].mxu1 }
 0x6e7   : > { %v2318_v17 = vmax.f32 %v2314_v28, %v5147_v22  ;;  %v5150_v54 = vpop.f32.mrb[70].mxu1 }
 0x6e8   : > { %v2321_v1 = vmax.f32 %v2317_v37, %v5150_v54  ;;  %v5153_v4 = vpop.f32.mrb[71].mxu1 }
 0x6e9   : > { %v2319_v52 = vmax.f32 %v2315_v10, %v5153_v4 }
 0x6ed   : > { %v5156_v45 = vpop.f32.mrb[72].mxu1 }
 0x6ee   : > { %v2324_v2 = vmax.f32 %v2320_v33, %v5156_v45  ;;  %v5159_v47 = vpop.f32.mrb[73].mxu1 }
 0x6ef   : > { %v2322_v8 = vmax.f32 %v2318_v17, %v5159_v47  ;;  %v5162_v56 = vpop.f32.mrb[74].mxu1 }
 0x6f0   : > { %v2325_v19 = vmax.f32 %v2321_v1, %v5162_v56  ;;  %v5165_v53 = vpop.f32.mrb[75].mxu1 }
 0x6f1   : > { %v2323_v24 = vmax.f32 %v2319_v52, %v5165_v53 }
 0x6f5   : > { %v5168_v60 = vpop.f32.mrb[76].mxu1 }
 0x6f6   : > { %v2328_v15 = vmax.f32 %v2324_v2, %v5168_v60  ;;  %v5171_v14 = vpop.f32.mrb[77].mxu1 }
 0x6f7   : > { %v2326_v48 = vmax.f32 %v2322_v8, %v5171_v14  ;;  %v5174_v51 = vpop.f32.mrb[78].mxu1 }
 0x6f8   : > { %v2329_v59 = vmax.f32 %v2325_v19, %v5174_v51  ;;  %v5177_v43 = vpop.f32.mrb[79].mxu1 }
 0x6f9   : > { %v2327_v3 = vmax.f32 %v2323_v24, %v5177_v43 }
 0x6fd   : > { %v5180_v30 = vpop.f32.mrb[80].mxu1 }
 0x6fe   : > { %v2332_v58 = vmax.f32 %v2328_v15, %v5180_v30  ;;  %v5183_v9 = vpop.f32.mrb[81].mxu1 }
 0x6ff   : > { %v2330_v27 = vmax.f32 %v2326_v48, %v5183_v9  ;;  %v5186_v32 = vpop.f32.mrb[82].mxu1 }
 0x700   : > { %v2333_v57 = vmax.f32 %v2329_v59, %v5186_v32  ;;  %v5189_v55 = vpop.f32.mrb[83].mxu1 }
 0x701   : > { %v2331_v63 = vmax.f32 %v2327_v3, %v5189_v55 }
 0x705   : > { %v5192_v13 = vpop.f32.mrb[84].mxu1 }
 0x706   : > { %v2336_v44 = vmax.f32 %v2332_v58, %v5192_v13  ;;  %v5195_v62 = vpop.f32.mrb[85].mxu1 }
 0x707   : > { %v2334_v25 = vmax.f32 %v2330_v27, %v5195_v62  ;;  %v5198_v41 = vpop.f32.mrb[86].mxu1 }
 0x708   : > { %v2337_v50 = vmax.f32 %v2333_v57, %v5198_v41  ;;  %v5201_v34 = vpop.f32.mrb[87].mxu1 }
 0x709   : > { %v2335_v12 = vmax.f32 %v2331_v63, %v5201_v34 }
 0x70a   : > { %v2339_v49 = vmax.f32 %v2336_v44, %v2337_v50 }
 0x70b   : > { %v2338_v7 = vmax.f32 %v2334_v25, %v2335_v12 }
 0x70d   : > { %v2340_v39 = vmax.f32 %v2338_v7, %v2339_v49 }
 0x70f   : > { %v2341_v16 = vrot.slane %v2340_v39, 4 }
 0x711   : > { %v2342_v31 = vmax.f32 %v2340_v39, %v2341_v16 }
 0x713   : > { %v2343_v46 = vrot.slane %v2342_v31, 2 }
 0x715   : > { %v2344_v0 = vmax.f32 %v2342_v31, %v2343_v46 }
 0x717   : > { %v2345_v28 = vrot.slane %v2344_v0, 1 }
 0x719   : > { %v5204_v37 = vmax.f32 %v2344_v0, %v2345_v28 }
 0x71b   : > { %v2347_v10 = vsub.f32 %v5110_v61, %v5204_v37  ;;  %v2348_v33 = vsub.f32 %v5114_v38, %v5204_v37  ;;  %v2349_v17 = vsub.f32 %v5108_v23, %v5204_v37  ;;  %v2350_v1 = vsub.f32 %v5112_v29, %v5204_v37 }
 0x71c   : > { %v2351_v52 = vsub.f32 %v5120_v18, %v5204_v37  ;;  %v2352_v2 = vsub.f32 %v5128_v40, %v5204_v37  ;;  %v2353_v8 = vsub.f32 %v5116_v11, %v5204_v37  ;;  %v2354_v61 = vsub.f32 %v5124_v6, %v5204_v37 }
 0x71d   : > { %v2355_v38 = vsub.f32 %v5135_v35, %v5204_v37  ;;  %v2356_v23 = vsub.f32 %v5141_v21, %v5204_v37  ;;  %v2357_v29 = vsub.f32 %v5132_v36, %v5204_v37  ;;  %v2358_v18 = vsub.f32 %v5138_v20, %v5204_v37 }
 0x71e   : > { %v2359_v40 = vsub.f32 %v5147_v22, %v5204_v37  ;;  %v2360_v11 = vsub.f32 %v5153_v4, %v5204_v37  ;;  %v2361_v6 = vsub.f32 %v5144_v42, %v5204_v37  ;;  %v2362_v35 = vsub.f32 %v5150_v54, %v5204_v37 }
 0x71f   : > { %v2363_v21 = vsub.f32 %v5159_v47, %v5204_v37  ;;  %v2364_v36 = vsub.f32 %v5165_v53, %v5204_v37  ;;  %v2365_v20 = vsub.f32 %v5156_v45, %v5204_v37  ;;  %v2366_v22 = vsub.f32 %v5162_v56, %v5204_v37 }
 0x720   : > { %v2367_v4 = vsub.f32 %v5171_v14, %v5204_v37  ;;  %v2368_v42 = vsub.f32 %v5177_v43, %v5204_v37  ;;  %v2369_v54 = vsub.f32 %v5168_v60, %v5204_v37  ;;  %v2370_v47 = vsub.f32 %v5174_v51, %v5204_v37 }
 0x721   : > { %v2371_v19 = vsub.f32 %v5183_v9, %v5204_v37  ;;  %v2372_v45 = vsub.f32 %v5189_v55, %v5204_v37  ;;  %v2373_v56 = vsub.f32 %v5180_v30, %v5204_v37  ;;  %v2374_v53 = vsub.f32 %v5186_v32, %v5204_v37 }
 0x722   : > { %v2375_v24 = vsub.f32 %v5195_v62, %v5204_v37  ;;  %v2376_v15 = vsub.f32 %v5201_v34, %v5204_v37  ;;  %v2377_v14 = vsub.f32 %v5192_v13, %v5204_v37  ;;  %v2378_v48 = vsub.f32 %v5198_v41, %v5204_v37 }
 0x723   : > { %v2379_v59 = vmul.f32 1.442695, %v2347_v10  ;;  %v2381_v3 = vmul.f32 1.442695, %v2348_v33  ;;  %v2383_v58 = vmul.f32 1.442695, %v2349_v17 }
 0x724   : > { %v2385_v27 = vmul.f32 1.442695, %v2350_v1  ;;  %v2387_v57 = vmul.f32 1.442695, %v2351_v52  ;;  %v2389_v63 = vmul.f32 1.442695, %v2352_v2 }
 0x725   : > { %3489 = vpow2.f32 %v2379_v59  ;;  %v2391_v44 = vmul.f32 1.442695, %v2353_v8  ;;  %v2393_v25 = vmul.f32 1.442695, %v2354_v61  ;;  %v2395_v50 = vmul.f32 1.442695, %v2355_v38 }
 0x726   : > { %3491 = vpow2.f32 %v2381_v3  ;;  %v2397_v12 = vmul.f32 1.442695, %v2356_v23  ;;  %v2399_v49 = vmul.f32 1.442695, %v2357_v29  ;;  %v2401_v7 = vmul.f32 1.442695, %v2358_v18 }
 0x727   : > { %3493 = vpow2.f32 %v2383_v58  ;;  %v2403_v39 = vmul.f32 1.442695, %v2359_v40  ;;  %v2405_v16 = vmul.f32 1.442695, %v2360_v11  ;;  %v2407_v46 = vmul.f32 1.442695, %v2361_v6 }
 0x728   : > { %3495 = vpow2.f32 %v2385_v27  ;;  %v2409_v28 = vmul.f32 1.442695, %v2362_v35  ;;  %v2411_v33 = vmul.f32 1.442695, %v2363_v21  ;;  %v2413_v2 = vmul.f32 1.442695, %v2364_v36 }
 0x729   : > { %3497 = vpow2.f32 %v2387_v57  ;;  %v2415_v61 = vmul.f32 1.442695, %v2365_v20  ;;  %v2417_v18 = vmul.f32 1.442695, %v2366_v22  ;;  %v2419_v11 = vmul.f32 1.442695, %v2367_v4 }
 0x72a   : > { %3499 = vpow2.f32 %v2389_v63  ;;  %v2421_v36 = vmul.f32 1.442695, %v2368_v42  ;;  %v2423_v22 = vmul.f32 1.442695, %v2369_v54  ;;  %v2425_v43 = vmul.f32 1.442695, %v2370_v47 }
 0x72b   : > { %3501 = vpow2.f32 %v2391_v44  ;;  %v2427_v60 = vmul.f32 1.442695, %v2371_v19  ;;  %v2429_v51 = vmul.f32 1.442695, %v2372_v45  ;;  %v2431_v9 = vmul.f32 1.442695, %v2373_v56 }
 0x72c   : > { %3503 = vpow2.f32 %v2393_v25  ;;  %v2433_v55 = vmul.f32 1.442695, %v2374_v53  ;;  %v2435_v30 = vmul.f32 1.442695, %v2375_v24  ;;  %v2437_v32 = vmul.f32 1.442695, %v2376_v15 }
 0x72d   : > { %3505 = vpow2.f32 %v2395_v50  ;;  %v2439_v50 = vmul.f32 1.442695, %v2377_v14 }
 0x72e   : > { %3507 = vpow2.f32 %v2397_v12 }
 0x72f   : > { %v5270_v31 = vpop.eup %3489  ;;  %3509 = vpow2.f32 %v2399_v49  ;;  %v2441_v49 = vmul.f32 1.442695, %v2378_v48 }
 0x730   : > { %v5272_v0 = vpop.eup %3491  ;;  %3511 = vpow2.f32 %v2401_v7 }
 0x731   : > { %v5274_v10 = vpop.eup %3493  ;;  %3513 = vpow2.f32 %v2403_v39  ;;  %v2443_v17 = vadd.f32 %v5272_v0, %v5270_v31  ;;  %v2480_v1 = vpack.c.bf16 %v5272_v0, %v5270_v31 }
 0x732   : > { %v5280_v52 = vpop.eup %3495  ;;  %3515 = vpow2.f32 %v2405_v16 }
 0x733   : > { %v5282_v8 = vpop.eup %3497  ;;  %3517 = vpow2.f32 %v2407_v46  ;;  %v2444_v38 = vadd.f32 %v5274_v10, %v2443_v17  ;;  %v2481_v23 = vpack.c.bf16 %v5280_v52, %v5274_v10 }
 0x734   : > { %v5287_v29 = vpop.eup %3499  ;;  %3519 = vpow2.f32 %v2409_v28 }
 0x735   : > { %v5289_v40 = vpop.eup %3501  ;;  %3521 = vpow2.f32 %v2411_v33  ;;  %v2445_v6 = vadd.f32 %v5280_v52, %v2444_v38  ;;  %v2482_v35 = vpack.c.bf16 %v5287_v29, %v5282_v8 }
 0x736   : > { %v5294_v21 = vpop.eup %3503  ;;  %3523 = vpow2.f32 %v2413_v2 }
 0x737   : > { %v5299_v20 = vpop.eup %3505  ;;  %3525 = vpow2.f32 %v2415_v61  ;;  %v2446_v4 = vadd.f32 %v5282_v8, %v2445_v6  ;;  %v2483_v59 = vpack.c.bf16 %v5294_v21, %v5289_v40 }
 0x738   : > { %v5307_v3 = vpop.eup %3507  ;;  %3527 = vpow2.f32 %v2417_v18 }
 0x739   : > { %v5312_v42 = vpop.eup %3509  ;;  %3529 = vpow2.f32 %v2419_v11  ;;  %v2447_v54 = vadd.f32 %v5287_v29, %v2446_v4  ;;  %v2484_v58 = vpack.c.bf16 %v5307_v3, %v5299_v20 }
 0x73a   : > { %v5320_v27 = vpop.eup %3511  ;;  %3531 = vpow2.f32 %v2421_v36 }
 0x73b   : > { %v5325_v47 = vpop.eup %3513  ;;  %3533 = vpow2.f32 %v2423_v22  ;;  %v2448_v19 = vadd.f32 %v5289_v40, %v2447_v54  ;;  %v2485_v57 = vpack.c.bf16 %v5320_v27, %v5312_v42 }
 0x73c   : > { %v5333_v63 = vpop.eup %3515  ;;  %3535 = vpow2.f32 %v2425_v43 }
 0x73d   : > { %v5338_v45 = vpop.eup %3517  ;;  %3537 = vpow2.f32 %v2427_v60  ;;  %v2449_v56 = vadd.f32 %v5294_v21, %v2448_v19  ;;  %v2486_v44 = vpack.c.bf16 %v5333_v63, %v5325_v47 }
 0x73e   : > { %v5346_v25 = vpop.eup %3519  ;;  %3539 = vpow2.f32 %v2429_v51 }
 0x73f   : > { %v3522_v53 = vpop.eup %3521  ;;  %3541 = vpow2.f32 %v2431_v9  ;;  %v2450_v62 = vadd.f32 %v5299_v20, %v2449_v56  ;;  %v2487_v24 = vpack.c.bf16 %v5346_v25, %v5338_v45  ;;  %v5565_v20 = vld [vmem:[#allocation38_spill] sm:$0xff] }
 0x740   : > { %v3524_v12 = vpop.eup %3523  ;;  %3543 = vpow2.f32 %v2433_v55 }
 0x741   : > { %v3526_v7 = vpop.eup %3525  ;;  %3545 = vpow2.f32 %v2435_v30  ;;  %v2451_v34 = vadd.f32 %v5307_v3, %v2450_v62  ;;  %v2488_v15 = vpack.c.bf16 %v3524_v12, %v3522_v53 }
 0x742   : > { %v3528_v39 = vpop.eup %3527  ;;  %3547 = vpow2.f32 %v2437_v32 }
 0x743   : > { %v3530_v13 = vpop.eup %3529  ;;  %3549 = vpow2.f32 %v2439_v50  ;;  %v2452_v14 = vadd.f32 %v5312_v42, %v2451_v34  ;;  %2996 = vmatprep.subr.bf16.mxu0 %v2488_v15  ;;  %v2489_v16 = vpack.c.bf16 %v3528_v39, %v3526_v7  ;;  %v2561_v15 = vpop.permute.xlu0 %2560 }
 0x744   : > { %v3532_v46 = vpop.eup %3531  ;;  %3551 = vpow2.f32 %v2441_v49  ;;  %2997 = vmatpush3.bf16.msra.mxu0 %v2480_v1  ;;  %v3290_v49 = vld [vmem:[%s5478_s4 + $0x8] sm:$0xff]  }
 0x745   : > { %v3534_v41 = vpop.eup %3533  ;;  %v2453_v37 = vadd.f32 %v5320_v27, %v2452_v14  ;;  %2998 = vmatprep.subr.bf16.mxu0 %v2489_v16  ;;  %v2490_v48 = vpack.c.bf16 %v3532_v46, %v3530_v13 }
 0x746   : > { %v3536_v28 = vpop.eup %3535 }
 0x747   : > { %v3538_v33 = vpop.eup %3537  ;;  %v2454_v17 = vadd.f32 %v5325_v47, %v2453_v37  ;;  %v2491_v2 = vpack.c.bf16 %v3536_v28, %v3534_v41 }
 0x748   : > { %v3540_v61 = vpop.eup %3539  ;;  %2999 = vmatpush3.bf16.msra.mxu0 %v2481_v23 }
 0x749   : > { %v3542_v38 = vpop.eup %3541  ;;  %v2455_v18 = vadd.f32 %v5333_v63, %v2454_v17  ;;  %3000 = vmatprep.subr.bf16.mxu0 %v2490_v48  ;;  %v2492_v31 = vpack.c.bf16 %v3540_v61, %v3538_v33 }
 0x74a   : > { %v3544_v0 = vpop.eup %3543 }
 0x74b   : > { %v3546_v1 = vpop.eup %3545  ;;  %v2456_v11 = vadd.f32 %v5338_v45, %v2455_v18  ;;  %v2493_v6 = vpack.c.bf16 %v3544_v0, %v3542_v38 }
 0x74c   : > { %v3548_v36 = vpop.eup %3547  ;;  %3001 = vmatpush3.bf16.msra.mxu0 %v2482_v35 }
 0x74d   : > { %v3550_v22 = vpop.eup %3549  ;;  %v2457_v4 = vadd.f32 %v5346_v25, %v2456_v11  ;;  %3002 = vmatprep.subr.bf16.mxu0 %v2491_v2  ;;  %v2494_v10 = vpack.c.bf16 %v3548_v36, %v3546_v1 }
 0x74e   : > { %v3552_v52 = vpop.eup %3551 }
 0x74f   : > { %v2458_v23 = vadd.f32 %v3522_v53, %v2457_v4  ;;  %v2495_v43 = vpack.c.bf16 %v3552_v52, %v3550_v22 }
 0x750   : > { %3003 = vmatpush3.bf16.msra.mxu0 %v2483_v59  ;;  %v2064_v59 = vpack.c.bf16 %v5565_v20, %v5565_v20 }
 0x751   : > { %v2459_v60 = vadd.f32 %v3524_v12, %v2458_v23  ;;  %3004 = vmatprep.subr.bf16.mxu0 %v2492_v31 }
 0x753   : > { %v2460_v54 = vadd.f32 %v3526_v7, %v2459_v60  ;;  %v2551_v7 = vpop.permute.xlu1 %2550 }
 0x754   : > { %3005 = vmatpush3.bf16.msra.mxu0 %v2484_v58 }
 0x755   : > { %v2461_v8 = vadd.f32 %v3528_v39, %v2460_v54  ;;  %3006 = vmatprep.subr.bf16.mxu0 %v2493_v6 }
 0x757   : > { %v2462_v29 = vadd.f32 %v3530_v13, %v2461_v8  ;;  %v2556_v34 = vpop.permute.xlu1 %2555 }
 0x758   : > { %3007 = vmatpush3.bf16.msra.mxu0 %v2485_v57  ;;  %v3289_v57 = vld [vmem:[%s5478_s4] sm:$0xff]  }
 0x759   : > { %v2463_v35 = vadd.f32 %v3532_v46, %v2462_v29  ;;  %3008 = vmatprep.subr.bf16.mxu0 %v2494_v10 }
 0x75b   : > { %v2464_v51 = vadd.f32 %v3534_v41, %v2463_v35 }
 0x75c   : > { %3009 = vmatpush3.bf16.msra.mxu0 %v2486_v44 }
 0x75d   : > { %v2465_v40 = vadd.f32 %v3536_v28, %v2464_v51  ;;  %3010 = vmatprep.subr.bf16.mxu0 %v2495_v43 }
 0x75f   : > { %v2466_v21 = vadd.f32 %v3538_v33, %v2465_v40 }
 0x760   : > { %3011 = vmatpush3.bf16.msra.mxu0 %v2487_v24 }
 0x761   : > { %v2467_v3 = vadd.f32 %v3540_v61, %v2466_v21  ;;  %3166 = vmatprep.subr.bf16.mxu0 %v4791_v5 }
 0x763   : > { %v2468_v58 = vadd.f32 %v3542_v38, %v2467_v3  ;;  %2529 = vmatmul.mubr.bf16.vlgmr.msra.gmra.mrb[72].mxu0 %v2064_v59 }
 0x764   : > { %3167 = vmatpush3.bf16.msra.mxu0 %v4791_v5  ;;  %3170 = vmatprep.mubr.msk.bf16.mxu0 %vm411_vm0, %v3289_v57 }
 0x765   : > { %v2469_v42 = vadd.f32 %v3544_v0, %v2468_v58 }
 0x767   : > { %v2470_v27 = vadd.f32 %v3546_v1, %v2469_v42 }
 0x769   : > { %v2471_v9 = vadd.f32 %v3548_v36, %v2470_v27 }
 0x76b   : > { %v2472_v19 = vadd.f32 %v3550_v22, %v2471_v9 }
 0x76d   : > { %v2473_v47 = vadd.f32 %v3552_v52, %v2472_v19 }
 0x76f   : > { %v2474_v63 = vrot.slane %v2473_v47, 4 }
 0x771   : > { %v2475_v55 = vadd.f32 %v2474_v63, %v2473_v47 }
 0x773   : > { %v2476_v45 = vrot.slane %v2475_v55, 2 }
 0x775   : > { %v2477_v30 = vadd.f32 %v2476_v45, %v2475_v55 }
 0x777   : > { %v2478_v56 = vrot.slane %v2477_v30, 1 }
 0x779   : > { %v2479_v44 = vadd.f32 %v2478_v56, %v2477_v30 }
 0x77b   : > { %3553 = vrcp.f32 %v2479_v44 }
 0x785   : > { %v3554_v50 = vpop.eup %3553 }
 0x836   : > { %v3012_v5 = vpop.f32.mrb[72].mxu0 }
 0x837   : > { %v3013_v25 = vpop.f32.mrb[73].mxu0 }
 0x838   : > { %v3014_v32 = vadd.f32 %v3013_v25, %v3012_v5  ;;  %v3015_v53 = vpop.f32.mrb[74].mxu0 }
 0x839   : > { %v3016_v62 = vpop.f32.mrb[75].mxu0 }
 0x83a   : > { %v2537_v24 = vmul.f32 %v3554_v50, %v3014_v32 }
 0x83c   : > { %v2539_v12 = vpack.c.bf16 %v2537_v24, %v5106_v26  ;;  %v2566_v26 = vpop.permute.xlu1 %2565 }
 0x83e   : > { %3168 = vmatprep.subr.bf16.mxu0 %v2539_v12 }
 0x83f   : > { %3169 = vmatpush3.bf16.msra.mxu0 %v2539_v12 }
 0x842   : > { %3171 = vmatmul.mubr.msk.bf16.vlgmr.msra.gmra.mrb[76].mxu0 %vm411_vm0, %v3290_v49 }
 0x915   : > { %v3172_v39 = vpop.f32.mrb[76].mxu0 }
 0x916   : > { %v2627_v13 = vadd.f32 %v3172_v39, %v2561_v15  ;;  %v2618_v14 = vpop.f32.mrb[77].mxu0 }
 0x917   : > { %v2619_v16 = vadd.f32 %v2618_v14, %v2551_v7  ;;  %v3173_v46 = vpop.f32.mrb[78].mxu0 }
 0x918   : > { %2635 = vst [vmem:[%s353_s0 + $0x10] sm:$0xff] %v2627_v13  ;;  %v2630_v41 = vadd.f32 %v3173_v46, %v2566_v26  ;;  %v2621_v37 = vpop.f32.mrb[79].mxu0 }
 0x919   : > { %2633 = vst [vmem:[%s353_s0] sm:$0xff] %v2619_v16  ;;  %v2622_v48 = vadd.f32 %v2621_v37, %v2556_v34 }
 0x91a   : > { %2636 = vst [vmem:[%s353_s0 + $0x18] sm:$0xff] %v2630_v41 }
 0x91b   : > { %2634 = vst [vmem:[%s353_s0 + $0x8] sm:$0xff] %v2622_v48 }
 0x91c   : > { %3596 = shalt.err (!%p3593_p1)
}
 0x91d   : > { %s3597_s29 = scalar_lea.hbm %s5409_s17, 512  ;;  %s3601_s19 = scalar_lea.hbm %s5480_s6, 2048 }
 0x91e   : > { %p3598_p3 = scmp.ne.s32.totalorder %s5409_s17, %s3597_s29  ;;  %p3602_p6 = scmp.lt.u32.totalorder %s5409_s17, %s5480_s6 }
 0x91f   : > { %p3603_p10 = scmp.lt.u32.totalorder %s3601_s19, %s3597_s29  ;;  %p3605_p7 = scmp.lt.u32.totalorder %s3597_s29, %s5409_s17 }
 0x920   : > { %p3599_p8 = pnand %p3598_p3, %p5566_p12 }
 0x921   : > { %p3604_p11 = por %p3603_p10, %p3602_p6 }
 0x922   : > { %p3600_p9 = pneg %p3599_p8 }
 0x923   : > { %p3606_p13 = por %p3605_p7, %p3604_p11 }
 0x925   : > { %p3607_p4 = pnand %p3606_p13, %p3600_p9 }
 0x927   : > { %3610 = shalt.err (!%p3607_p4)
}
 0x928   : > { %s3712_s15 = smov 128   ;;  %s3713_s27 = smov 256  }
 0x929   : > { %s3714_s28 = smov 8  }
 0x92a   : > { %3180 = dma.vmem_to_hbm [thread:$0]  (%p5566_p12), %s5404_s13, 512, %s5409_s17, %s5413_s22, %s3712_s15, %s3713_s27, %s3714_s28  }
 0x92b PF: > { %p3186_p0 = scmp.ge.s32.totalorder %s3705_s7, 2  ;;  %s2667_s9 = sand.u32 1, %s3665_s21  }
 0x92c   : > { %p5567_p2 = scmp.ne.s32.totalorder %s5495_s8, 0  ;;  %s2668_s12 = scalar_lea.sflag [#allocation5], %s2667_s9 }
 0x92e   : > { %p3183_p5 = pnand %p3186_p0, %p5567_p2 }
 0x930   : > { %3660 = dma.done.wait (!%p3183_p5), %s2668_s12, 512  }
 0x931   : > { %3662 = vsyncadd (!%p3183_p5), %s2668_s12, 4294966784  ;;  %s22_s7 = sadd.s32 1, %s3705_s7   ;;  %s5568_s14 = sld [smem:[#allocation12_spill]] }
 0x932   : > { %p19_p1 = scmp.ge.s32.totalorder %s22_s7, 6   ;;  %s5569_s10 = sld [smem:[#allocation13_spill]] }
 0x933   : > { %s5570_s27 = sld [smem:[#allocation9_spill]]  ;;  %s5571_s29 = sld [smem:[#allocation10_spill]] }
 0x934   : > { %s5572_s13 = sld [smem:[#allocation11_spill]]  ;;  %s5573_s21 = smov %s3681_s25 }
 0x935   : > { %s5574_s22 = smov %s3673_s23  ;;  %s5575_s23 = smov %s3677_s24 }
 0x936   : > { %s5577_s25 = smov %s3685_s26  ;;  %s5579_s28 = smov %s3701_s30 }
 0x937   : > { %s5576_s24 = smov %s5568_s14  ;;  %21 = sbr.rel (!%p19_p1) target bundleno = 11 (0xb), region = 135 }
 0x938   : > { %s5578_s26 = smov %s5569_s10 }
 0x93a   : > { %s5580_s30 = smov %s5572_s13 }
 0x93e   :  { %2673 = vsyncpa [#allocation4], 1 }
 0x93f   :  { %2675 = vsyncpa [#allocation4 + $0x1], 1 }
 0x940   :  { %2676 = vsyncpa [#allocation5], 1 }
 0x941   :  { %2678 = vsyncpa [#allocation5 + $0x1], 1 }

</bundles_post_ra>
